<compile_context>
chip_gen: v6e
topology: v6e:2x2x1
jax: 0.10.0
libtpu: 0.0.40
codegen_flags: <defaults>
</compile_context>

<pallas_src>
import functools
import math

import jax
import jax.numpy as jnp
from jax.experimental import pallas as pl
from jax.experimental.pallas import tpu as pltpu

# ----- small BERT-style config -----
VOCAB = 64
TYPE_VOCAB = 2
MAX_POS = 16
HIDDEN = 32
N_HEADS = 4
HEAD_DIM = HIDDEN // N_HEADS
INTERMEDIATE = 64
N_LAYERS = 2
NUM_LABELS = 3
LN_EPS = 1e-12


# ---------------- in-kernel helpers ----------------
def _mm(x, w):
    """MXU matmul: activation cast to bf16, weight already pre-cast bf16, f32 accum."""
    return jnp.dot(x.astype(jnp.bfloat16), w, preferred_element_type=jnp.float32)


def _mm_act(a, b):
    """activation @ activation (both f32 values), bf16 MXU operands, f32 accum."""
    return jnp.dot(a.astype(jnp.bfloat16), b.astype(jnp.bfloat16),
                   preferred_element_type=jnp.float32)


def _mm_nt(a, b):
    """a @ b.T without materializing a transpose (trans_b-style dot)."""
    return jax.lax.dot_general(
        a.astype(jnp.bfloat16), b.astype(jnp.bfloat16),
        dimension_numbers=(((1,), (1,)), ((), ())),
        preferred_element_type=jnp.float32)


def _layernorm(x, g, b, eps=LN_EPS):
    mean = jnp.mean(x, axis=-1, keepdims=True)
    var = jnp.mean(jnp.square(x - mean), axis=-1, keepdims=True)
    return (x - mean) * jax.lax.rsqrt(var + eps) * g + b


def _softmax_lastdim(s):
    m = jnp.max(s, axis=-1, keepdims=True)
    e = jnp.exp(s - m)
    return e * pl.reciprocal(jnp.sum(e, axis=-1, keepdims=True), approx=True)


def _gelu(x):
    # TODO(synk): HF BERT uses exact erf GELU; tanh approximation used here.
    return 0.5 * x * (1.0 + jnp.tanh(0.7978845608028654 * (x + 0.044715 * x * x * x)))


# ---------------- fused forward kernel ----------------
def _fused_bert_kernel(emb_ref, bias_ref,
                       emb_ln_g_ref, emb_ln_b_ref,
                       qkv_w_ref, qkv_b_ref, o_w_ref, o_b_ref,
                       ln1_g_ref, ln1_b_ref,
                       ff1_w_ref, ff1_b_ref, ff2_w_ref, ff2_b_ref,
                       ln2_g_ref, ln2_b_ref,
                       pool_w_ref, pool_b_ref, clf_w_ref, clf_b_ref,
                       logits_ref, pooled_ref,
                       *, batch, seq):
    B, S, H, nH, Dh = batch, seq, HIDDEN, N_HEADS, HEAD_DIM

    # embeddings LayerNorm (input already = word + pos + type embedding sum)
    h = _layernorm(emb_ref[...].astype(jnp.float32),
                   emb_ln_g_ref[...], emb_ln_b_ref[...])          # (B*S, H)

    # block-diagonal additive attention bias, (B*S, B*S): padded keys -> -1e4,
    # cross-batch key blocks -> -1e9. Loaded ONCE and reused by every layer /
    # head (avoids re-emitting the broadcast nH*B times per layer).
    bias = bias_ref[...]

    for l in range(N_LAYERS):                                     # unrolled; layers stacked on dim 0
        # fused QKV projection (1/sqrt(Dh) pre-folded into the Q slice of the weights)
        qkv = _mm(h, qkv_w_ref[l]) + qkv_b_ref[l]                 # (B*S, 3H)

        # attention with the batch dim folded into the score matmul: per head,
        # ONE (B*S, B*S) score tile and ONE (B*S, Dh) context tile. Context
        # tiles stay in registers and are concatenated along lanes — no VMEM
        # scratch, no masked scatter stores.
        ctx_heads = []
        for hd in range(nH):
            q_h = qkv[:, hd * Dh:(hd + 1) * Dh]                   # (B*S, Dh)
            k_h = qkv[:, H + hd * Dh:H + (hd + 1) * Dh]           # (B*S, Dh)
            v_h = qkv[:, 2 * H + hd * Dh:2 * H + (hd + 1) * Dh]   # (B*S, Dh)
            s = _mm_nt(q_h, k_h) + bias                           # (B*S, B*S)
            p = _softmax_lastdim(s)
            ctx_heads.append(_mm_act(p, v_h))                     # (B*S, Dh)
        ctx = jnp.concatenate(ctx_heads, axis=-1)                 # (B*S, H)

        attn_out = _mm(ctx, o_w_ref[l]) + o_b_ref[l]
        h = _layernorm(h + attn_out, ln1_g_ref[l], ln1_b_ref[l])  # residual fused into LN

        ff = _gelu(_mm(h, ff1_w_ref[l]) + ff1_b_ref[l])
        ff = _mm(ff, ff2_w_ref[l]) + ff2_b_ref[l]
        h = _layernorm(h + ff, ln2_g_ref[l], ln2_b_ref[l])        # residual fused into LN

    # CLS rows selected BEFORE the pooler: pooler + classifier run on a (B, H)
    # tile; each output is written with one dense store (no per-row loop).
    # dropout = identity (eval).
    h_cls = jnp.concatenate([h[b * S:b * S + 1, :] for b in range(B)], axis=0)  # (B, H)
    pooled = jnp.tanh(_mm(h_cls, pool_w_ref[...]) + pool_b_ref[...])            # (B, H)
    logits = _mm(pooled, clf_w_ref[...]) + clf_b_ref[...]                       # (B, NUM_LABELS)
    pooled_ref[...] = pooled.astype(pooled_ref.dtype)
    logits_ref[...] = logits.astype(logits_ref.dtype)


# ---------------- Parameter init (deterministic, synthetic) ----------------
def _dense(key, fan_in, fan_out):
    return {"w": jax.random.normal(key, (fan_in, fan_out), jnp.float32) * 0.02,
            "b": jnp.zeros((fan_out,), jnp.float32)}


def init_params(key):
    keys = iter(jax.random.split(key, 8 + 8 * N_LAYERS))
    params = {
        "word_emb": jax.random.normal(next(keys), (VOCAB, HIDDEN), jnp.float32) * 0.02,
        "pos_emb": jax.random.normal(next(keys), (MAX_POS, HIDDEN), jnp.float32) * 0.02,
        "type_emb": jax.random.normal(next(keys), (TYPE_VOCAB, HIDDEN), jnp.float32) * 0.02,
        "emb_ln_g": jnp.ones((HIDDEN,), jnp.float32),
        "emb_ln_b": jnp.zeros((HIDDEN,), jnp.float32),
        "layers": [],
        "pooler": _dense(next(keys), HIDDEN, HIDDEN),
        "classifier": _dense(next(keys), HIDDEN, NUM_LABELS),
    }
    for _ in range(N_LAYERS):
        params["layers"].append({
            "q": _dense(next(keys), HIDDEN, HIDDEN),
            "k": _dense(next(keys), HIDDEN, HIDDEN),
            "v": _dense(next(keys), HIDDEN, HIDDEN),
            "o": _dense(next(keys), HIDDEN, HIDDEN),
            "ln1_g": jnp.ones((HIDDEN,), jnp.float32),
            "ln1_b": jnp.zeros((HIDDEN,), jnp.float32),
            "ff1": _dense(next(keys), HIDDEN, INTERMEDIATE),
            "ff2": _dense(next(keys), INTERMEDIATE, HIDDEN),
            "ln2_g": jnp.ones((HIDDEN,), jnp.float32),
            "ln2_b": jnp.zeros((HIDDEN,), jnp.float32),
        })
    return params


def pack_params(params):
    """Concatenate Q/K/V, stack per-layer weights on a leading layer axis, and
    pre-cast every weight MATRIX to bf16 (biases / LN params stay f32)."""
    scale = 1.0 / math.sqrt(HEAD_DIM)
    bf16 = lambda x: x.astype(jnp.bfloat16)
    qkv_w, qkv_b, o_w, o_b = [], [], [], []
    ln1_g, ln1_b, ff1_w, ff1_b, ff2_w, ff2_b, ln2_g, ln2_b = ([] for _ in range(8))
    for lp in params["layers"]:
        # fold 1/sqrt(Dh) attention scale into Q weights/bias (in f32, then cast)
        qkv_w.append(bf16(jnp.concatenate(
            [lp["q"]["w"] * scale, lp["k"]["w"], lp["v"]["w"]], axis=1)))
        qkv_b.append(jnp.concatenate(
            [lp["q"]["b"] * scale, lp["k"]["b"], lp["v"]["b"]], axis=0)[None, :])
        o_w.append(bf16(lp["o"]["w"])); o_b.append(lp["o"]["b"][None, :])
        ln1_g.append(lp["ln1_g"][None, :]); ln1_b.append(lp["ln1_b"][None, :])
        ff1_w.append(bf16(lp["ff1"]["w"])); ff1_b.append(lp["ff1"]["b"][None, :])
        ff2_w.append(bf16(lp["ff2"]["w"])); ff2_b.append(lp["ff2"]["b"][None, :])
        ln2_g.append(lp["ln2_g"][None, :]); ln2_b.append(lp["ln2_b"][None, :])
    stack = lambda xs: jnp.stack(xs, axis=0)
    return dict(
        emb_ln_g=params["emb_ln_g"][None, :], emb_ln_b=params["emb_ln_b"][None, :],
        qkv_w=stack(qkv_w), qkv_b=stack(qkv_b),
        o_w=stack(o_w), o_b=stack(o_b),
        ln1_g=stack(ln1_g), ln1_b=stack(ln1_b),
        ff1_w=stack(ff1_w), ff1_b=stack(ff1_b),
        ff2_w=stack(ff2_w), ff2_b=stack(ff2_b),
        ln2_g=stack(ln2_g), ln2_b=stack(ln2_b),
        pool_w=bf16(params["pooler"]["w"]), pool_b=params["pooler"]["b"][None, :],
        clf_w=bf16(params["classifier"]["w"]), clf_b=params["classifier"]["b"][None, :],
    )


# ---------------- Forward pass (matches BERTSeqClf.forward defaults) ----------------
def bert_seq_clf_forward(params, input_ids, attention_mask, token_type_ids):
    B, S = input_ids.shape
    assert S <= MAX_POS, "sequence length exceeds position-embedding table"
    packed = pack_params(params)

    # embedding gathers are plain-JAX glue (no clean Pallas gather at this scale)
    emb = (jnp.take(params["word_emb"], input_ids, axis=0)
           + params["pos_emb"][jnp.arange(S)][None, :, :]
           + jnp.take(params["type_emb"], token_type_ids, axis=0)).reshape(B * S, HIDDEN)

    # block-diagonal (B*S, B*S) additive bias for batch-folded attention:
    #   same-batch padded keys -> -1e4 (HF-style), cross-batch blocks -> -1e9.
    key_bias = ((1.0 - attention_mask.astype(jnp.float32)) * -10000.0).reshape(B * S)
    same_batch = jnp.kron(jnp.eye(B, dtype=jnp.float32),
                          jnp.ones((S, S), jnp.float32))          # (B*S, B*S)
    attn_bias = key_bias[None, :] * same_batch + (1.0 - same_batch) * -1e9

    ordered = [
        emb, attn_bias,
        packed["emb_ln_g"], packed["emb_ln_b"],
        packed["qkv_w"], packed["qkv_b"], packed["o_w"], packed["o_b"],
        packed["ln1_g"], packed["ln1_b"],
        packed["ff1_w"], packed["ff1_b"], packed["ff2_w"], packed["ff2_b"],
        packed["ln2_g"], packed["ln2_b"],
        packed["pool_w"], packed["pool_b"], packed["clf_w"], packed["clf_b"],
    ]

    def full_spec(a):
        nd = a.ndim
        return pl.BlockSpec(a.shape, lambda i, _nd=nd: (0,) * _nd)

    logits, pooled = pl.pallas_call(
        functools.partial(_fused_bert_kernel, batch=B, seq=S),
        out_shape=(jax.ShapeDtypeStruct((B, NUM_LABELS), jnp.float32),
                   jax.ShapeDtypeStruct((B, HIDDEN), jnp.float32)),
        grid=(1,),
        in_specs=[full_spec(a) for a in ordered],
        out_specs=(pl.BlockSpec((B, NUM_LABELS), lambda i: (0, 0)),
                   pl.BlockSpec((B, HIDDEN), lambda i: (0, 0))),
        compiler_params=pltpu.CompilerParams(
            # single grid step; whole model is VMEM-resident (single-TC design —
            # batch is folded into the attention tiles rather than grid-split)
            dimension_semantics=("arbitrary",)),
    )(*ordered)

    # self.dropout: identity at inference; wiki/senti/graph branches disabled by defaults.
    concated_output = pooled
    return logits, concated_output


if __name__ == "__main__":
    key = jax.random.PRNGKey(0)
    k_param, k_ids, k_mask = jax.random.split(key, 3)

    B, S = 2, 8
    params = init_params(k_param)
    input_ids = jax.random.randint(k_ids, (B, S), 0, VOCAB, dtype=jnp.int32)
    attention_mask = jnp.ones((B, S), jnp.int32).at[1, 6:].set(0)  # pad last tokens of seq 1
    token_type_ids = jnp.zeros((B, S), jnp.int32)

    fwd = jax.jit(bert_seq_clf_forward)
    logits, concated = fwd(params, input_ids, attention_mask, token_type_ids)
    jax.block_until_ready((logits, concated))
    assert logits.shape == (B, NUM_LABELS) and concated.shape == (B, HIDDEN)
    assert bool(jnp.all(jnp.isfinite(logits))) and bool(jnp.all(jnp.isfinite(concated)))
    print("KERNEL_OK")
</pallas_src>

<mosaic_0001>
module attributes {stable_mosaic.version = 11 : i64} {
  func.func @_fused_bert_kernel(%arg0: i32, %arg1: memref<16x32xf32, #tpu.memory_space<vmem>>, %arg2: memref<16x16xf32, #tpu.memory_space<vmem>>, %arg3: memref<1x32xf32, #tpu.memory_space<vmem>>, %arg4: memref<1x32xf32, #tpu.memory_space<vmem>>, %arg5: memref<2x32x96xbf16, #tpu.memory_space<vmem>>, %arg6: memref<2x1x96xf32, #tpu.memory_space<vmem>>, %arg7: memref<2x32x32xbf16, #tpu.memory_space<vmem>>, %arg8: memref<2x1x32xf32, #tpu.memory_space<vmem>>, %arg9: memref<2x1x32xf32, #tpu.memory_space<vmem>>, %arg10: memref<2x1x32xf32, #tpu.memory_space<vmem>>, %arg11: memref<2x32x64xbf16, #tpu.memory_space<vmem>>, %arg12: memref<2x1x64xf32, #tpu.memory_space<vmem>>, %arg13: memref<2x64x32xbf16, #tpu.memory_space<vmem>>, %arg14: memref<2x1x32xf32, #tpu.memory_space<vmem>>, %arg15: memref<2x1x32xf32, #tpu.memory_space<vmem>>, %arg16: memref<2x1x32xf32, #tpu.memory_space<vmem>>, %arg17: memref<32x32xbf16, #tpu.memory_space<vmem>>, %arg18: memref<1x32xf32, #tpu.memory_space<vmem>>, %arg19: memref<32x3xbf16, #tpu.memory_space<vmem>>, %arg20: memref<1x3xf32, #tpu.memory_space<vmem>>, %arg21: memref<2x3xf32, #tpu.memory_space<vmem>>, %arg22: memref<2x32xf32, #tpu.memory_space<vmem>>) attributes {dimension_semantics = [#tpu.dimension_semantics<arbitrary>], iteration_bounds = array<i64: 1>, scalar_prefetch = 0 : i64, scratch_operands = 0 : i64, tpu.core_type = #tpu.core_type<tc>, window_params = [{pipeline_mode = #tpu.pipeline_mode<synchronous>, transform_indices = @transform_0, window_bounds = array<i64: 16, 32>}, {pipeline_mode = #tpu.pipeline_mode<synchronous>, transform_indices = @transform_1, window_bounds = array<i64: 16, 16>}, {pipeline_mode = #tpu.pipeline_mode<synchronous>, transform_indices = @transform_2, window_bounds = array<i64: 1, 32>}, {pipeline_mode = #tpu.pipeline_mode<synchronous>, transform_indices = @transform_3, window_bounds = array<i64: 1, 32>}, {pipeline_mode = #tpu.pipeline_mode<synchronous>, transform_indices = @transform_4, window_bounds = array<i64: 2, 32, 96>}, {pipeline_mode = #tpu.pipeline_mode<synchronous>, transform_indices = @transform_5, window_bounds = array<i64: 2, 1, 96>}, {pipeline_mode = #tpu.pipeline_mode<synchronous>, transform_indices = @transform_6, window_bounds = array<i64: 2, 32, 32>}, {pipeline_mode = #tpu.pipeline_mode<synchronous>, transform_indices = @transform_7, window_bounds = array<i64: 2, 1, 32>}, {pipeline_mode = #tpu.pipeline_mode<synchronous>, transform_indices = @transform_8, window_bounds = array<i64: 2, 1, 32>}, {pipeline_mode = #tpu.pipeline_mode<synchronous>, transform_indices = @transform_9, window_bounds = array<i64: 2, 1, 32>}, {pipeline_mode = #tpu.pipeline_mode<synchronous>, transform_indices = @transform_10, window_bounds = array<i64: 2, 32, 64>}, {pipeline_mode = #tpu.pipeline_mode<synchronous>, transform_indices = @transform_11, window_bounds = array<i64: 2, 1, 64>}, {pipeline_mode = #tpu.pipeline_mode<synchronous>, transform_indices = @transform_12, window_bounds = array<i64: 2, 64, 32>}, {pipeline_mode = #tpu.pipeline_mode<synchronous>, transform_indices = @transform_13, window_bounds = array<i64: 2, 1, 32>}, {pipeline_mode = #tpu.pipeline_mode<synchronous>, transform_indices = @transform_14, window_bounds = array<i64: 2, 1, 32>}, {pipeline_mode = #tpu.pipeline_mode<synchronous>, transform_indices = @transform_15, window_bounds = array<i64: 2, 1, 32>}, {pipeline_mode = #tpu.pipeline_mode<synchronous>, transform_indices = @transform_16, window_bounds = array<i64: 32, 32>}, {pipeline_mode = #tpu.pipeline_mode<synchronous>, transform_indices = @transform_17, window_bounds = array<i64: 1, 32>}, {pipeline_mode = #tpu.pipeline_mode<synchronous>, transform_indices = @transform_18, window_bounds = array<i64: 32, 3>}, {pipeline_mode = #tpu.pipeline_mode<synchronous>, transform_indices = @transform_19, window_bounds = array<i64: 1, 3>}, {pipeline_mode = #tpu.pipeline_mode<synchronous>, transform_indices = @transform_20, window_bounds = array<i64: 2, 3>}, {pipeline_mode = #tpu.pipeline_mode<synchronous>, transform_indices = @transform_21, window_bounds = array<i64: 2, 32>}]} {
    %c0 = arith.constant 0 : index
    %c0_0 = arith.constant 0 : index
    %0 = vector.load %arg1[%c0, %c0_0] : memref<16x32xf32, #tpu.memory_space<vmem>>, vector<16x32xf32>
    %c0_1 = arith.constant 0 : index
    %c0_2 = arith.constant 0 : index
    %1 = vector.load %arg3[%c0_1, %c0_2] : memref<1x32xf32, #tpu.memory_space<vmem>>, vector<1x32xf32>
    %c0_3 = arith.constant 0 : index
    %c0_4 = arith.constant 0 : index
    %2 = vector.load %arg4[%c0_3, %c0_4] : memref<1x32xf32, #tpu.memory_space<vmem>>, vector<1x32xf32>
    %cst = arith.constant dense<0.000000e+00> : vector<16xf32>
    %3 = vector.multi_reduction <add>, %0, %cst [1] : vector<16x32xf32> to vector<16xf32>
    %4 = vector.shape_cast %3 : vector<16xf32> to vector<16x1xf32>
    %cst_5 = arith.constant 3.200000e+01 : f32
    %5 = vector.broadcast %cst_5 : f32 to vector<16x1xf32>
    %6 = arith.divf %4, %5 : vector<16x1xf32>
    %7 = vector.broadcast %6 : vector<16x1xf32> to vector<16x32xf32>
    %8 = arith.subf %0, %7 : vector<16x32xf32>
    %9 = arith.mulf %8, %8 : vector<16x32xf32>
    %cst_6 = arith.constant dense<0.000000e+00> : vector<16xf32>
    %10 = vector.multi_reduction <add>, %9, %cst_6 [1] : vector<16x32xf32> to vector<16xf32>
    %11 = vector.shape_cast %10 : vector<16xf32> to vector<16x1xf32>
    %cst_7 = arith.constant 3.200000e+01 : f32
    %12 = vector.broadcast %cst_7 : f32 to vector<16x1xf32>
    %13 = arith.divf %11, %12 : vector<16x1xf32>
    %14 = vector.broadcast %6 : vector<16x1xf32> to vector<16x32xf32>
    %15 = arith.subf %0, %14 : vector<16x32xf32>
    %cst_8 = arith.constant 9.99999996E-13 : f32
    %16 = vector.broadcast %cst_8 : f32 to vector<16x1xf32>
    %17 = arith.addf %13, %16 : vector<16x1xf32>
    %18 = math.rsqrt %17 : vector<16x1xf32>
    %19 = vector.broadcast %18 : vector<16x1xf32> to vector<16x32xf32>
    %20 = arith.mulf %15, %19 : vector<16x32xf32>
    %21 = vector.broadcast %1 : vector<1x32xf32> to vector<16x32xf32>
    %22 = arith.mulf %20, %21 : vector<16x32xf32>
    %23 = vector.broadcast %2 : vector<1x32xf32> to vector<16x32xf32>
    %24 = arith.addf %22, %23 : vector<16x32xf32>
    %c0_9 = arith.constant 0 : index
    %c0_10 = arith.constant 0 : index
    %25 = vector.load %arg2[%c0_9, %c0_10] : memref<16x16xf32, #tpu.memory_space<vmem>>, vector<16x16xf32>
    %c0_11 = arith.constant 0 : index
    %c0_12 = arith.constant 0 : index
    %c0_13 = arith.constant 0 : index
    %26 = vector.load %arg5[%c0_11, %c0_12, %c0_13] : memref<2x32x96xbf16, #tpu.memory_space<vmem>>, vector<1x32x96xbf16>
    %27 = vector.shape_cast %26 : vector<1x32x96xbf16> to vector<32x96xbf16>
    %28 = arith.truncf %24 : vector<16x32xf32> to vector<16x32xbf16>
    %cst_14 = arith.constant dense<0.000000e+00> : vector<16x96xf32>
    %29 = tpu.matmul %28, %27, %cst_14 {dimension_numbers = #tpu.dot_dimension_numbers<[1], [0], [0], [1], [0, 0, 1, 1], [], []>} : vector<16x32xbf16>, vector<32x96xbf16>, vector<16x96xf32> -> vector<16x96xf32>
    %c0_15 = arith.constant 0 : index
    %c0_16 = arith.constant 0 : index
    %c0_17 = arith.constant 0 : index
    %30 = vector.load %arg6[%c0_15, %c0_16, %c0_17] : memref<2x1x96xf32, #tpu.memory_space<vmem>>, vector<1x1x96xf32>
    %31 = vector.shape_cast %30 : vector<1x1x96xf32> to vector<1x96xf32>
    %32 = vector.broadcast %31 : vector<1x96xf32> to vector<16x96xf32>
    %33 = arith.addf %29, %32 : vector<16x96xf32>
    %34 = vector.extract_strided_slice %33 {offsets = [0, 0], sizes = [16, 8], strides = [1, 1]} : vector<16x96xf32> to vector<16x8xf32>
    %35 = vector.extract_strided_slice %33 {offsets = [0, 32], sizes = [16, 8], strides = [1, 1]} : vector<16x96xf32> to vector<16x8xf32>
    %36 = vector.extract_strided_slice %33 {offsets = [0, 64], sizes = [16, 8], strides = [1, 1]} : vector<16x96xf32> to vector<16x8xf32>
    %37 = arith.truncf %34 : vector<16x8xf32> to vector<16x8xbf16>
    %38 = arith.truncf %35 : vector<16x8xf32> to vector<16x8xbf16>
    %cst_18 = arith.constant dense<0.000000e+00> : vector<16x16xf32>
    %39 = tpu.matmul %37, %38, %cst_18 {dimension_numbers = #tpu.dot_dimension_numbers<[1], [1], [0], [0], [0, 0, 1, 0], [], []>} : vector<16x8xbf16>, vector<16x8xbf16>, vector<16x16xf32> -> vector<16x16xf32>
    %40 = arith.addf %39, %25 : vector<16x16xf32>
    %cst_19 = arith.constant dense<0xFF800000> : vector<16xf32>
    %41 = vector.multi_reduction <maximumf>, %40, %cst_19 [1] : vector<16x16xf32> to vector<16xf32>
    %42 = vector.shape_cast %41 : vector<16xf32> to vector<16x1xf32>
    %43 = vector.broadcast %42 : vector<16x1xf32> to vector<16x16xf32>
    %44 = arith.subf %40, %43 : vector<16x16xf32>
    %45 = math.exp %44 : vector<16x16xf32>
    %cst_20 = arith.constant dense<0.000000e+00> : vector<16xf32>
    %46 = vector.multi_reduction <add>, %45, %cst_20 [1] : vector<16x16xf32> to vector<16xf32>
    %47 = vector.shape_cast %46 : vector<16xf32> to vector<16x1xf32>
    %48 = tpu.reciprocal %47 {approx = true} : vector<16x1xf32> -> vector<16x1xf32>
    %49 = vector.broadcast %48 : vector<16x1xf32> to vector<16x16xf32>
    %50 = arith.mulf %45, %49 : vector<16x16xf32>
    %51 = arith.truncf %50 : vector<16x16xf32> to vector<16x16xbf16>
    %52 = arith.truncf %36 : vector<16x8xf32> to vector<16x8xbf16>
    %cst_21 = arith.constant dense<0.000000e+00> : vector<16x8xf32>
    %53 = tpu.matmul %51, %52, %cst_21 {dimension_numbers = #tpu.dot_dimension_numbers<[1], [0], [0], [1], [0, 0, 1, 1], [], []>} : vector<16x16xbf16>, vector<16x8xbf16>, vector<16x8xf32> -> vector<16x8xf32>
    %54 = vector.extract_strided_slice %33 {offsets = [0, 8], sizes = [16, 8], strides = [1, 1]} : vector<16x96xf32> to vector<16x8xf32>
    %55 = vector.extract_strided_slice %33 {offsets = [0, 40], sizes = [16, 8], strides = [1, 1]} : vector<16x96xf32> to vector<16x8xf32>
    %56 = vector.extract_strided_slice %33 {offsets = [0, 72], sizes = [16, 8], strides = [1, 1]} : vector<16x96xf32> to vector<16x8xf32>
    %57 = arith.truncf %54 : vector<16x8xf32> to vector<16x8xbf16>
    %58 = arith.truncf %55 : vector<16x8xf32> to vector<16x8xbf16>
    %cst_22 = arith.constant dense<0.000000e+00> : vector<16x16xf32>
    %59 = tpu.matmul %57, %58, %cst_22 {dimension_numbers = #tpu.dot_dimension_numbers<[1], [1], [0], [0], [0, 0, 1, 0], [], []>} : vector<16x8xbf16>, vector<16x8xbf16>, vector<16x16xf32> -> vector<16x16xf32>
    %60 = arith.addf %59, %25 : vector<16x16xf32>
    %cst_23 = arith.constant dense<0xFF800000> : vector<16xf32>
    %61 = vector.multi_reduction <maximumf>, %60, %cst_23 [1] : vector<16x16xf32> to vector<16xf32>
    %62 = vector.shape_cast %61 : vector<16xf32> to vector<16x1xf32>
    %63 = vector.broadcast %62 : vector<16x1xf32> to vector<16x16xf32>
    %64 = arith.subf %60, %63 : vector<16x16xf32>
    %65 = math.exp %64 : vector<16x16xf32>
    %cst_24 = arith.constant dense<0.000000e+00> : vector<16xf32>
    %66 = vector.multi_reduction <add>, %65, %cst_24 [1] : vector<16x16xf32> to vector<16xf32>
    %67 = vector.shape_cast %66 : vector<16xf32> to vector<16x1xf32>
    %68 = tpu.reciprocal %67 {approx = true} : vector<16x1xf32> -> vector<16x1xf32>
    %69 = vector.broadcast %68 : vector<16x1xf32> to vector<16x16xf32>
    %70 = arith.mulf %65, %69 : vector<16x16xf32>
    %71 = arith.truncf %70 : vector<16x16xf32> to vector<16x16xbf16>
    %72 = arith.truncf %56 : vector<16x8xf32> to vector<16x8xbf16>
    %cst_25 = arith.constant dense<0.000000e+00> : vector<16x8xf32>
    %73 = tpu.matmul %71, %72, %cst_25 {dimension_numbers = #tpu.dot_dimension_numbers<[1], [0], [0], [1], [0, 0, 1, 1], [], []>} : vector<16x16xbf16>, vector<16x8xbf16>, vector<16x8xf32> -> vector<16x8xf32>
    %74 = vector.extract_strided_slice %33 {offsets = [0, 16], sizes = [16, 8], strides = [1, 1]} : vector<16x96xf32> to vector<16x8xf32>
    %75 = vector.extract_strided_slice %33 {offsets = [0, 48], sizes = [16, 8], strides = [1, 1]} : vector<16x96xf32> to vector<16x8xf32>
    %76 = vector.extract_strided_slice %33 {offsets = [0, 80], sizes = [16, 8], strides = [1, 1]} : vector<16x96xf32> to vector<16x8xf32>
    %77 = arith.truncf %74 : vector<16x8xf32> to vector<16x8xbf16>
    %78 = arith.truncf %75 : vector<16x8xf32> to vector<16x8xbf16>
    %cst_26 = arith.constant dense<0.000000e+00> : vector<16x16xf32>
    %79 = tpu.matmul %77, %78, %cst_26 {dimension_numbers = #tpu.dot_dimension_numbers<[1], [1], [0], [0], [0, 0, 1, 0], [], []>} : vector<16x8xbf16>, vector<16x8xbf16>, vector<16x16xf32> -> vector<16x16xf32>
    %80 = arith.addf %79, %25 : vector<16x16xf32>
    %cst_27 = arith.constant dense<0xFF800000> : vector<16xf32>
    %81 = vector.multi_reduction <maximumf>, %80, %cst_27 [1] : vector<16x16xf32> to vector<16xf32>
    %82 = vector.shape_cast %81 : vector<16xf32> to vector<16x1xf32>
    %83 = vector.broadcast %82 : vector<16x1xf32> to vector<16x16xf32>
    %84 = arith.subf %80, %83 : vector<16x16xf32>
    %85 = math.exp %84 : vector<16x16xf32>
    %cst_28 = arith.constant dense<0.000000e+00> : vector<16xf32>
    %86 = vector.multi_reduction <add>, %85, %cst_28 [1] : vector<16x16xf32> to vector<16xf32>
    %87 = vector.shape_cast %86 : vector<16xf32> to vector<16x1xf32>
    %88 = tpu.reciprocal %87 {approx = true} : vector<16x1xf32> -> vector<16x1xf32>
    %89 = vector.broadcast %88 : vector<16x1xf32> to vector<16x16xf32>
    %90 = arith.mulf %85, %89 : vector<16x16xf32>
    %91 = arith.truncf %90 : vector<16x16xf32> to vector<16x16xbf16>
    %92 = arith.truncf %76 : vector<16x8xf32> to vector<16x8xbf16>
    %cst_29 = arith.constant dense<0.000000e+00> : vector<16x8xf32>
    %93 = tpu.matmul %91, %92, %cst_29 {dimension_numbers = #tpu.dot_dimension_numbers<[1], [0], [0], [1], [0, 0, 1, 1], [], []>} : vector<16x16xbf16>, vector<16x8xbf16>, vector<16x8xf32> -> vector<16x8xf32>
    %94 = vector.extract_strided_slice %33 {offsets = [0, 24], sizes = [16, 8], strides = [1, 1]} : vector<16x96xf32> to vector<16x8xf32>
    %95 = vector.extract_strided_slice %33 {offsets = [0, 56], sizes = [16, 8], strides = [1, 1]} : vector<16x96xf32> to vector<16x8xf32>
    %96 = vector.extract_strided_slice %33 {offsets = [0, 88], sizes = [16, 8], strides = [1, 1]} : vector<16x96xf32> to vector<16x8xf32>
    %97 = arith.truncf %94 : vector<16x8xf32> to vector<16x8xbf16>
    %98 = arith.truncf %95 : vector<16x8xf32> to vector<16x8xbf16>
    %cst_30 = arith.constant dense<0.000000e+00> : vector<16x16xf32>
    %99 = tpu.matmul %97, %98, %cst_30 {dimension_numbers = #tpu.dot_dimension_numbers<[1], [1], [0], [0], [0, 0, 1, 0], [], []>} : vector<16x8xbf16>, vector<16x8xbf16>, vector<16x16xf32> -> vector<16x16xf32>
    %100 = arith.addf %99, %25 : vector<16x16xf32>
    %cst_31 = arith.constant dense<0xFF800000> : vector<16xf32>
    %101 = vector.multi_reduction <maximumf>, %100, %cst_31 [1] : vector<16x16xf32> to vector<16xf32>
    %102 = vector.shape_cast %101 : vector<16xf32> to vector<16x1xf32>
    %103 = vector.broadcast %102 : vector<16x1xf32> to vector<16x16xf32>
    %104 = arith.subf %100, %103 : vector<16x16xf32>
    %105 = math.exp %104 : vector<16x16xf32>
    %cst_32 = arith.constant dense<0.000000e+00> : vector<16xf32>
    %106 = vector.multi_reduction <add>, %105, %cst_32 [1] : vector<16x16xf32> to vector<16xf32>
    %107 = vector.shape_cast %106 : vector<16xf32> to vector<16x1xf32>
    %108 = tpu.reciprocal %107 {approx = true} : vector<16x1xf32> -> vector<16x1xf32>
    %109 = vector.broadcast %108 : vector<16x1xf32> to vector<16x16xf32>
    %110 = arith.mulf %105, %109 : vector<16x16xf32>
    %111 = arith.truncf %110 : vector<16x16xf32> to vector<16x16xbf16>
    %112 = arith.truncf %96 : vector<16x8xf32> to vector<16x8xbf16>
    %cst_33 = arith.constant dense<0.000000e+00> : vector<16x8xf32>
    %113 = tpu.matmul %111, %112, %cst_33 {dimension_numbers = #tpu.dot_dimension_numbers<[1], [0], [0], [1], [0, 0, 1, 1], [], []>} : vector<16x16xbf16>, vector<16x8xbf16>, vector<16x8xf32> -> vector<16x8xf32>
    %114 = tpu.concatenate %53, %73, %93, %113 in 1 : vector<16x8xf32>, vector<16x8xf32>, vector<16x8xf32>, vector<16x8xf32> -> vector<16x32xf32>
    %c0_34 = arith.constant 0 : index
    %c0_35 = arith.constant 0 : index
    %c0_36 = arith.constant 0 : index
    %115 = vector.load %arg7[%c0_34, %c0_35, %c0_36] : memref<2x32x32xbf16, #tpu.memory_space<vmem>>, vector<1x32x32xbf16>
    %116 = vector.shape_cast %115 : vector<1x32x32xbf16> to vector<32x32xbf16>
    %117 = arith.truncf %114 : vector<16x32xf32> to vector<16x32xbf16>
    %cst_37 = arith.constant dense<0.000000e+00> : vector<16x32xf32>
    %118 = tpu.matmul %117, %116, %cst_37 {dimension_numbers = #tpu.dot_dimension_numbers<[1], [0], [0], [1], [0, 0, 1, 1], [], []>} : vector<16x32xbf16>, vector<32x32xbf16>, vector<16x32xf32> -> vector<16x32xf32>
    %c0_38 = arith.constant 0 : index
    %c0_39 = arith.constant 0 : index
    %c0_40 = arith.constant 0 : index
    %119 = vector.load %arg8[%c0_38, %c0_39, %c0_40] : memref<2x1x32xf32, #tpu.memory_space<vmem>>, vector<1x1x32xf32>
    %120 = vector.shape_cast %119 : vector<1x1x32xf32> to vector<1x32xf32>
    %121 = vector.broadcast %120 : vector<1x32xf32> to vector<16x32xf32>
    %122 = arith.addf %118, %121 : vector<16x32xf32>
    %123 = arith.addf %24, %122 : vector<16x32xf32>
    %c0_41 = arith.constant 0 : index
    %c0_42 = arith.constant 0 : index
    %c0_43 = arith.constant 0 : index
    %124 = vector.load %arg9[%c0_41, %c0_42, %c0_43] : memref<2x1x32xf32, #tpu.memory_space<vmem>>, vector<1x1x32xf32>
    %125 = vector.shape_cast %124 : vector<1x1x32xf32> to vector<1x32xf32>
    %c0_44 = arith.constant 0 : index
    %c0_45 = arith.constant 0 : index
    %c0_46 = arith.constant 0 : index
    %126 = vector.load %arg10[%c0_44, %c0_45, %c0_46] : memref<2x1x32xf32, #tpu.memory_space<vmem>>, vector<1x1x32xf32>
    %127 = vector.shape_cast %126 : vector<1x1x32xf32> to vector<1x32xf32>
    %cst_47 = arith.constant dense<0.000000e+00> : vector<16xf32>
    %128 = vector.multi_reduction <add>, %123, %cst_47 [1] : vector<16x32xf32> to vector<16xf32>
    %129 = vector.shape_cast %128 : vector<16xf32> to vector<16x1xf32>
    %cst_48 = arith.constant 3.200000e+01 : f32
    %130 = vector.broadcast %cst_48 : f32 to vector<16x1xf32>
    %131 = arith.divf %129, %130 : vector<16x1xf32>
    %132 = vector.broadcast %131 : vector<16x1xf32> to vector<16x32xf32>
    %133 = arith.subf %123, %132 : vector<16x32xf32>
    %134 = arith.mulf %133, %133 : vector<16x32xf32>
    %cst_49 = arith.constant dense<0.000000e+00> : vector<16xf32>
    %135 = vector.multi_reduction <add>, %134, %cst_49 [1] : vector<16x32xf32> to vector<16xf32>
    %136 = vector.shape_cast %135 : vector<16xf32> to vector<16x1xf32>
    %cst_50 = arith.constant 3.200000e+01 : f32
    %137 = vector.broadcast %cst_50 : f32 to vector<16x1xf32>
    %138 = arith.divf %136, %137 : vector<16x1xf32>
    %139 = vector.broadcast %131 : vector<16x1xf32> to vector<16x32xf32>
    %140 = arith.subf %123, %139 : vector<16x32xf32>
    %cst_51 = arith.constant 9.99999996E-13 : f32
    %141 = vector.broadcast %cst_51 : f32 to vector<16x1xf32>
    %142 = arith.addf %138, %141 : vector<16x1xf32>
    %143 = math.rsqrt %142 : vector<16x1xf32>
    %144 = vector.broadcast %143 : vector<16x1xf32> to vector<16x32xf32>
    %145 = arith.mulf %140, %144 : vector<16x32xf32>
    %146 = vector.broadcast %125 : vector<1x32xf32> to vector<16x32xf32>
    %147 = arith.mulf %145, %146 : vector<16x32xf32>
    %148 = vector.broadcast %127 : vector<1x32xf32> to vector<16x32xf32>
    %149 = arith.addf %147, %148 : vector<16x32xf32>
    %c0_52 = arith.constant 0 : index
    %c0_53 = arith.constant 0 : index
    %c0_54 = arith.constant 0 : index
    %150 = vector.load %arg11[%c0_52, %c0_53, %c0_54] : memref<2x32x64xbf16, #tpu.memory_space<vmem>>, vector<1x32x64xbf16>
    %151 = vector.shape_cast %150 : vector<1x32x64xbf16> to vector<32x64xbf16>
    %152 = arith.truncf %149 : vector<16x32xf32> to vector<16x32xbf16>
    %cst_55 = arith.constant dense<0.000000e+00> : vector<16x64xf32>
    %153 = tpu.matmul %152, %151, %cst_55 {dimension_numbers = #tpu.dot_dimension_numbers<[1], [0], [0], [1], [0, 0, 1, 1], [], []>} : vector<16x32xbf16>, vector<32x64xbf16>, vector<16x64xf32> -> vector<16x64xf32>
    %c0_56 = arith.constant 0 : index
    %c0_57 = arith.constant 0 : index
    %c0_58 = arith.constant 0 : index
    %154 = vector.load %arg12[%c0_56, %c0_57, %c0_58] : memref<2x1x64xf32, #tpu.memory_space<vmem>>, vector<1x1x64xf32>
    %155 = vector.shape_cast %154 : vector<1x1x64xf32> to vector<1x64xf32>
    %156 = vector.broadcast %155 : vector<1x64xf32> to vector<16x64xf32>
    %157 = arith.addf %153, %156 : vector<16x64xf32>
    %cst_59 = arith.constant 5.000000e-01 : f32
    %158 = vector.broadcast %cst_59 : f32 to vector<16x64xf32>
    %159 = arith.mulf %158, %157 : vector<16x64xf32>
    %cst_60 = arith.constant 4.471500e-02 : f32
    %160 = vector.broadcast %cst_60 : f32 to vector<16x64xf32>
    %161 = arith.mulf %160, %157 : vector<16x64xf32>
    %162 = arith.mulf %161, %157 : vector<16x64xf32>
    %163 = arith.mulf %162, %157 : vector<16x64xf32>
    %164 = arith.addf %157, %163 : vector<16x64xf32>
    %cst_61 = arith.constant 0.797884583 : f32
    %165 = vector.broadcast %cst_61 : f32 to vector<16x64xf32>
    %166 = arith.mulf %165, %164 : vector<16x64xf32>
    %167 = math.tanh %166 : vector<16x64xf32>
    %cst_62 = arith.constant 1.000000e+00 : f32
    %168 = vector.broadcast %cst_62 : f32 to vector<16x64xf32>
    %169 = arith.addf %168, %167 : vector<16x64xf32>
    %170 = arith.mulf %159, %169 : vector<16x64xf32>
    %c0_63 = arith.constant 0 : index
    %c0_64 = arith.constant 0 : index
    %c0_65 = arith.constant 0 : index
    %171 = vector.load %arg13[%c0_63, %c0_64, %c0_65] : memref<2x64x32xbf16, #tpu.memory_space<vmem>>, vector<1x64x32xbf16>
    %172 = vector.shape_cast %171 : vector<1x64x32xbf16> to vector<64x32xbf16>
    %173 = arith.truncf %170 : vector<16x64xf32> to vector<16x64xbf16>
    %cst_66 = arith.constant dense<0.000000e+00> : vector<16x32xf32>
    %174 = tpu.matmul %173, %172, %cst_66 {dimension_numbers = #tpu.dot_dimension_numbers<[1], [0], [0], [1], [0, 0, 1, 1], [], []>} : vector<16x64xbf16>, vector<64x32xbf16>, vector<16x32xf32> -> vector<16x32xf32>
    %c0_67 = arith.constant 0 : index
    %c0_68 = arith.constant 0 : index
    %c0_69 = arith.constant 0 : index
    %175 = vector.load %arg14[%c0_67, %c0_68, %c0_69] : memref<2x1x32xf32, #tpu.memory_space<vmem>>, vector<1x1x32xf32>
    %176 = vector.shape_cast %175 : vector<1x1x32xf32> to vector<1x32xf32>
    %177 = vector.broadcast %176 : vector<1x32xf32> to vector<16x32xf32>
    %178 = arith.addf %174, %177 : vector<16x32xf32>
    %179 = arith.addf %149, %178 : vector<16x32xf32>
    %c0_70 = arith.constant 0 : index
    %c0_71 = arith.constant 0 : index
    %c0_72 = arith.constant 0 : index
    %180 = vector.load %arg15[%c0_70, %c0_71, %c0_72] : memref<2x1x32xf32, #tpu.memory_space<vmem>>, vector<1x1x32xf32>
    %181 = vector.shape_cast %180 : vector<1x1x32xf32> to vector<1x32xf32>
    %c0_73 = arith.constant 0 : index
    %c0_74 = arith.constant 0 : index
    %c0_75 = arith.constant 0 : index
    %182 = vector.load %arg16[%c0_73, %c0_74, %c0_75] : memref<2x1x32xf32, #tpu.memory_space<vmem>>, vector<1x1x32xf32>
    %183 = vector.shape_cast %182 : vector<1x1x32xf32> to vector<1x32xf32>
    %cst_76 = arith.constant dense<0.000000e+00> : vector<16xf32>
    %184 = vector.multi_reduction <add>, %179, %cst_76 [1] : vector<16x32xf32> to vector<16xf32>
    %185 = vector.shape_cast %184 : vector<16xf32> to vector<16x1xf32>
    %cst_77 = arith.constant 3.200000e+01 : f32
    %186 = vector.broadcast %cst_77 : f32 to vector<16x1xf32>
    %187 = arith.divf %185, %186 : vector<16x1xf32>
    %188 = vector.broadcast %187 : vector<16x1xf32> to vector<16x32xf32>
    %189 = arith.subf %179, %188 : vector<16x32xf32>
    %190 = arith.mulf %189, %189 : vector<16x32xf32>
    %cst_78 = arith.constant dense<0.000000e+00> : vector<16xf32>
    %191 = vector.multi_reduction <add>, %190, %cst_78 [1] : vector<16x32xf32> to vector<16xf32>
    %192 = vector.shape_cast %191 : vector<16xf32> to vector<16x1xf32>
    %cst_79 = arith.constant 3.200000e+01 : f32
    %193 = vector.broadcast %cst_79 : f32 to vector<16x1xf32>
    %194 = arith.divf %192, %193 : vector<16x1xf32>
    %195 = vector.broadcast %187 : vector<16x1xf32> to vector<16x32xf32>
    %196 = arith.subf %179, %195 : vector<16x32xf32>
    %cst_80 = arith.constant 9.99999996E-13 : f32
    %197 = vector.broadcast %cst_80 : f32 to vector<16x1xf32>
    %198 = arith.addf %194, %197 : vector<16x1xf32>
    %199 = math.rsqrt %198 : vector<16x1xf32>
    %200 = vector.broadcast %199 : vector<16x1xf32> to vector<16x32xf32>
    %201 = arith.mulf %196, %200 : vector<16x32xf32>
    %202 = vector.broadcast %181 : vector<1x32xf32> to vector<16x32xf32>
    %203 = arith.mulf %201, %202 : vector<16x32xf32>
    %204 = vector.broadcast %183 : vector<1x32xf32> to vector<16x32xf32>
    %205 = arith.addf %203, %204 : vector<16x32xf32>
    %c1 = arith.constant 1 : index
    %c0_81 = arith.constant 0 : index
    %c0_82 = arith.constant 0 : index
    %206 = vector.load %arg5[%c1, %c0_81, %c0_82] : memref<2x32x96xbf16, #tpu.memory_space<vmem>>, vector<1x32x96xbf16>
    %207 = vector.shape_cast %206 : vector<1x32x96xbf16> to vector<32x96xbf16>
    %208 = arith.truncf %205 : vector<16x32xf32> to vector<16x32xbf16>
    %cst_83 = arith.constant dense<0.000000e+00> : vector<16x96xf32>
    %209 = tpu.matmul %208, %207, %cst_83 {dimension_numbers = #tpu.dot_dimension_numbers<[1], [0], [0], [1], [0, 0, 1, 1], [], []>} : vector<16x32xbf16>, vector<32x96xbf16>, vector<16x96xf32> -> vector<16x96xf32>
    %c1_84 = arith.constant 1 : index
    %c0_85 = arith.constant 0 : index
    %c0_86 = arith.constant 0 : index
    %210 = vector.load %arg6[%c1_84, %c0_85, %c0_86] : memref<2x1x96xf32, #tpu.memory_space<vmem>>, vector<1x1x96xf32>
    %211 = vector.shape_cast %210 : vector<1x1x96xf32> to vector<1x96xf32>
    %212 = vector.broadcast %211 : vector<1x96xf32> to vector<16x96xf32>
    %213 = arith.addf %209, %212 : vector<16x96xf32>
    %214 = vector.extract_strided_slice %213 {offsets = [0, 0], sizes = [16, 8], strides = [1, 1]} : vector<16x96xf32> to vector<16x8xf32>
    %215 = vector.extract_strided_slice %213 {offsets = [0, 32], sizes = [16, 8], strides = [1, 1]} : vector<16x96xf32> to vector<16x8xf32>
    %216 = vector.extract_strided_slice %213 {offsets = [0, 64], sizes = [16, 8], strides = [1, 1]} : vector<16x96xf32> to vector<16x8xf32>
    %217 = arith.truncf %214 : vector<16x8xf32> to vector<16x8xbf16>
    %218 = arith.truncf %215 : vector<16x8xf32> to vector<16x8xbf16>
    %cst_87 = arith.constant dense<0.000000e+00> : vector<16x16xf32>
    %219 = tpu.matmul %217, %218, %cst_87 {dimension_numbers = #tpu.dot_dimension_numbers<[1], [1], [0], [0], [0, 0, 1, 0], [], []>} : vector<16x8xbf16>, vector<16x8xbf16>, vector<16x16xf32> -> vector<16x16xf32>
    %220 = arith.addf %219, %25 : vector<16x16xf32>
    %cst_88 = arith.constant dense<0xFF800000> : vector<16xf32>
    %221 = vector.multi_reduction <maximumf>, %220, %cst_88 [1] : vector<16x16xf32> to vector<16xf32>
    %222 = vector.shape_cast %221 : vector<16xf32> to vector<16x1xf32>
    %223 = vector.broadcast %222 : vector<16x1xf32> to vector<16x16xf32>
    %224 = arith.subf %220, %223 : vector<16x16xf32>
    %225 = math.exp %224 : vector<16x16xf32>
    %cst_89 = arith.constant dense<0.000000e+00> : vector<16xf32>
    %226 = vector.multi_reduction <add>, %225, %cst_89 [1] : vector<16x16xf32> to vector<16xf32>
    %227 = vector.shape_cast %226 : vector<16xf32> to vector<16x1xf32>
    %228 = tpu.reciprocal %227 {approx = true} : vector<16x1xf32> -> vector<16x1xf32>
    %229 = vector.broadcast %228 : vector<16x1xf32> to vector<16x16xf32>
    %230 = arith.mulf %225, %229 : vector<16x16xf32>
    %231 = arith.truncf %230 : vector<16x16xf32> to vector<16x16xbf16>
    %232 = arith.truncf %216 : vector<16x8xf32> to vector<16x8xbf16>
    %cst_90 = arith.constant dense<0.000000e+00> : vector<16x8xf32>
    %233 = tpu.matmul %231, %232, %cst_90 {dimension_numbers = #tpu.dot_dimension_numbers<[1], [0], [0], [1], [0, 0, 1, 1], [], []>} : vector<16x16xbf16>, vector<16x8xbf16>, vector<16x8xf32> -> vector<16x8xf32>
    %234 = vector.extract_strided_slice %213 {offsets = [0, 8], sizes = [16, 8], strides = [1, 1]} : vector<16x96xf32> to vector<16x8xf32>
    %235 = vector.extract_strided_slice %213 {offsets = [0, 40], sizes = [16, 8], strides = [1, 1]} : vector<16x96xf32> to vector<16x8xf32>
    %236 = vector.extract_strided_slice %213 {offsets = [0, 72], sizes = [16, 8], strides = [1, 1]} : vector<16x96xf32> to vector<16x8xf32>
    %237 = arith.truncf %234 : vector<16x8xf32> to vector<16x8xbf16>
    %238 = arith.truncf %235 : vector<16x8xf32> to vector<16x8xbf16>
    %cst_91 = arith.constant dense<0.000000e+00> : vector<16x16xf32>
    %239 = tpu.matmul %237, %238, %cst_91 {dimension_numbers = #tpu.dot_dimension_numbers<[1], [1], [0], [0], [0, 0, 1, 0], [], []>} : vector<16x8xbf16>, vector<16x8xbf16>, vector<16x16xf32> -> vector<16x16xf32>
    %240 = arith.addf %239, %25 : vector<16x16xf32>
    %cst_92 = arith.constant dense<0xFF800000> : vector<16xf32>
    %241 = vector.multi_reduction <maximumf>, %240, %cst_92 [1] : vector<16x16xf32> to vector<16xf32>
    %242 = vector.shape_cast %241 : vector<16xf32> to vector<16x1xf32>
    %243 = vector.broadcast %242 : vector<16x1xf32> to vector<16x16xf32>
    %244 = arith.subf %240, %243 : vector<16x16xf32>
    %245 = math.exp %244 : vector<16x16xf32>
    %cst_93 = arith.constant dense<0.000000e+00> : vector<16xf32>
    %246 = vector.multi_reduction <add>, %245, %cst_93 [1] : vector<16x16xf32> to vector<16xf32>
    %247 = vector.shape_cast %246 : vector<16xf32> to vector<16x1xf32>
    %248 = tpu.reciprocal %247 {approx = true} : vector<16x1xf32> -> vector<16x1xf32>
    %249 = vector.broadcast %248 : vector<16x1xf32> to vector<16x16xf32>
    %250 = arith.mulf %245, %249 : vector<16x16xf32>
    %251 = arith.truncf %250 : vector<16x16xf32> to vector<16x16xbf16>
    %252 = arith.truncf %236 : vector<16x8xf32> to vector<16x8xbf16>
    %cst_94 = arith.constant dense<0.000000e+00> : vector<16x8xf32>
    %253 = tpu.matmul %251, %252, %cst_94 {dimension_numbers = #tpu.dot_dimension_numbers<[1], [0], [0], [1], [0, 0, 1, 1], [], []>} : vector<16x16xbf16>, vector<16x8xbf16>, vector<16x8xf32> -> vector<16x8xf32>
    %254 = vector.extract_strided_slice %213 {offsets = [0, 16], sizes = [16, 8], strides = [1, 1]} : vector<16x96xf32> to vector<16x8xf32>
    %255 = vector.extract_strided_slice %213 {offsets = [0, 48], sizes = [16, 8], strides = [1, 1]} : vector<16x96xf32> to vector<16x8xf32>
    %256 = vector.extract_strided_slice %213 {offsets = [0, 80], sizes = [16, 8], strides = [1, 1]} : vector<16x96xf32> to vector<16x8xf32>
    %257 = arith.truncf %254 : vector<16x8xf32> to vector<16x8xbf16>
    %258 = arith.truncf %255 : vector<16x8xf32> to vector<16x8xbf16>
    %cst_95 = arith.constant dense<0.000000e+00> : vector<16x16xf32>
    %259 = tpu.matmul %257, %258, %cst_95 {dimension_numbers = #tpu.dot_dimension_numbers<[1], [1], [0], [0], [0, 0, 1, 0], [], []>} : vector<16x8xbf16>, vector<16x8xbf16>, vector<16x16xf32> -> vector<16x16xf32>
    %260 = arith.addf %259, %25 : vector<16x16xf32>
    %cst_96 = arith.constant dense<0xFF800000> : vector<16xf32>
    %261 = vector.multi_reduction <maximumf>, %260, %cst_96 [1] : vector<16x16xf32> to vector<16xf32>
    %262 = vector.shape_cast %261 : vector<16xf32> to vector<16x1xf32>
    %263 = vector.broadcast %262 : vector<16x1xf32> to vector<16x16xf32>
    %264 = arith.subf %260, %263 : vector<16x16xf32>
    %265 = math.exp %264 : vector<16x16xf32>
    %cst_97 = arith.constant dense<0.000000e+00> : vector<16xf32>
    %266 = vector.multi_reduction <add>, %265, %cst_97 [1] : vector<16x16xf32> to vector<16xf32>
    %267 = vector.shape_cast %266 : vector<16xf32> to vector<16x1xf32>
    %268 = tpu.reciprocal %267 {approx = true} : vector<16x1xf32> -> vector<16x1xf32>
    %269 = vector.broadcast %268 : vector<16x1xf32> to vector<16x16xf32>
    %270 = arith.mulf %265, %269 : vector<16x16xf32>
    %271 = arith.truncf %270 : vector<16x16xf32> to vector<16x16xbf16>
    %272 = arith.truncf %256 : vector<16x8xf32> to vector<16x8xbf16>
    %cst_98 = arith.constant dense<0.000000e+00> : vector<16x8xf32>
    %273 = tpu.matmul %271, %272, %cst_98 {dimension_numbers = #tpu.dot_dimension_numbers<[1], [0], [0], [1], [0, 0, 1, 1], [], []>} : vector<16x16xbf16>, vector<16x8xbf16>, vector<16x8xf32> -> vector<16x8xf32>
    %274 = vector.extract_strided_slice %213 {offsets = [0, 24], sizes = [16, 8], strides = [1, 1]} : vector<16x96xf32> to vector<16x8xf32>
    %275 = vector.extract_strided_slice %213 {offsets = [0, 56], sizes = [16, 8], strides = [1, 1]} : vector<16x96xf32> to vector<16x8xf32>
    %276 = vector.extract_strided_slice %213 {offsets = [0, 88], sizes = [16, 8], strides = [1, 1]} : vector<16x96xf32> to vector<16x8xf32>
    %277 = arith.truncf %274 : vector<16x8xf32> to vector<16x8xbf16>
    %278 = arith.truncf %275 : vector<16x8xf32> to vector<16x8xbf16>
    %cst_99 = arith.constant dense<0.000000e+00> : vector<16x16xf32>
    %279 = tpu.matmul %277, %278, %cst_99 {dimension_numbers = #tpu.dot_dimension_numbers<[1], [1], [0], [0], [0, 0, 1, 0], [], []>} : vector<16x8xbf16>, vector<16x8xbf16>, vector<16x16xf32> -> vector<16x16xf32>
    %280 = arith.addf %279, %25 : vector<16x16xf32>
    %cst_100 = arith.constant dense<0xFF800000> : vector<16xf32>
    %281 = vector.multi_reduction <maximumf>, %280, %cst_100 [1] : vector<16x16xf32> to vector<16xf32>
    %282 = vector.shape_cast %281 : vector<16xf32> to vector<16x1xf32>
    %283 = vector.broadcast %282 : vector<16x1xf32> to vector<16x16xf32>
    %284 = arith.subf %280, %283 : vector<16x16xf32>
    %285 = math.exp %284 : vector<16x16xf32>
    %cst_101 = arith.constant dense<0.000000e+00> : vector<16xf32>
    %286 = vector.multi_reduction <add>, %285, %cst_101 [1] : vector<16x16xf32> to vector<16xf32>
    %287 = vector.shape_cast %286 : vector<16xf32> to vector<16x1xf32>
    %288 = tpu.reciprocal %287 {approx = true} : vector<16x1xf32> -> vector<16x1xf32>
    %289 = vector.broadcast %288 : vector<16x1xf32> to vector<16x16xf32>
    %290 = arith.mulf %285, %289 : vector<16x16xf32>
    %291 = arith.truncf %290 : vector<16x16xf32> to vector<16x16xbf16>
    %292 = arith.truncf %276 : vector<16x8xf32> to vector<16x8xbf16>
    %cst_102 = arith.constant dense<0.000000e+00> : vector<16x8xf32>
    %293 = tpu.matmul %291, %292, %cst_102 {dimension_numbers = #tpu.dot_dimension_numbers<[1], [0], [0], [1], [0, 0, 1, 1], [], []>} : vector<16x16xbf16>, vector<16x8xbf16>, vector<16x8xf32> -> vector<16x8xf32>
    %294 = tpu.concatenate %233, %253, %273, %293 in 1 : vector<16x8xf32>, vector<16x8xf32>, vector<16x8xf32>, vector<16x8xf32> -> vector<16x32xf32>
    %c1_103 = arith.constant 1 : index
    %c0_104 = arith.constant 0 : index
    %c0_105 = arith.constant 0 : index
    %295 = vector.load %arg7[%c1_103, %c0_104, %c0_105] : memref<2x32x32xbf16, #tpu.memory_space<vmem>>, vector<1x32x32xbf16>
    %296 = vector.shape_cast %295 : vector<1x32x32xbf16> to vector<32x32xbf16>
    %297 = arith.truncf %294 : vector<16x32xf32> to vector<16x32xbf16>
    %cst_106 = arith.constant dense<0.000000e+00> : vector<16x32xf32>
    %298 = tpu.matmul %297, %296, %cst_106 {dimension_numbers = #tpu.dot_dimension_numbers<[1], [0], [0], [1], [0, 0, 1, 1], [], []>} : vector<16x32xbf16>, vector<32x32xbf16>, vector<16x32xf32> -> vector<16x32xf32>
    %c1_107 = arith.constant 1 : index
    %c0_108 = arith.constant 0 : index
    %c0_109 = arith.constant 0 : index
    %299 = vector.load %arg8[%c1_107, %c0_108, %c0_109] : memref<2x1x32xf32, #tpu.memory_space<vmem>>, vector<1x1x32xf32>
    %300 = vector.shape_cast %299 : vector<1x1x32xf32> to vector<1x32xf32>
    %301 = vector.broadcast %300 : vector<1x32xf32> to vector<16x32xf32>
    %302 = arith.addf %298, %301 : vector<16x32xf32>
    %303 = arith.addf %205, %302 : vector<16x32xf32>
    %c1_110 = arith.constant 1 : index
    %c0_111 = arith.constant 0 : index
    %c0_112 = arith.constant 0 : index
    %304 = vector.load %arg9[%c1_110, %c0_111, %c0_112] : memref<2x1x32xf32, #tpu.memory_space<vmem>>, vector<1x1x32xf32>
    %305 = vector.shape_cast %304 : vector<1x1x32xf32> to vector<1x32xf32>
    %c1_113 = arith.constant 1 : index
    %c0_114 = arith.constant 0 : index
    %c0_115 = arith.constant 0 : index
    %306 = vector.load %arg10[%c1_113, %c0_114, %c0_115] : memref<2x1x32xf32, #tpu.memory_space<vmem>>, vector<1x1x32xf32>
    %307 = vector.shape_cast %306 : vector<1x1x32xf32> to vector<1x32xf32>
    %cst_116 = arith.constant dense<0.000000e+00> : vector<16xf32>
    %308 = vector.multi_reduction <add>, %303, %cst_116 [1] : vector<16x32xf32> to vector<16xf32>
    %309 = vector.shape_cast %308 : vector<16xf32> to vector<16x1xf32>
    %cst_117 = arith.constant 3.200000e+01 : f32
    %310 = vector.broadcast %cst_117 : f32 to vector<16x1xf32>
    %311 = arith.divf %309, %310 : vector<16x1xf32>
    %312 = vector.broadcast %311 : vector<16x1xf32> to vector<16x32xf32>
    %313 = arith.subf %303, %312 : vector<16x32xf32>
    %314 = arith.mulf %313, %313 : vector<16x32xf32>
    %cst_118 = arith.constant dense<0.000000e+00> : vector<16xf32>
    %315 = vector.multi_reduction <add>, %314, %cst_118 [1] : vector<16x32xf32> to vector<16xf32>
    %316 = vector.shape_cast %315 : vector<16xf32> to vector<16x1xf32>
    %cst_119 = arith.constant 3.200000e+01 : f32
    %317 = vector.broadcast %cst_119 : f32 to vector<16x1xf32>
    %318 = arith.divf %316, %317 : vector<16x1xf32>
    %319 = vector.broadcast %311 : vector<16x1xf32> to vector<16x32xf32>
    %320 = arith.subf %303, %319 : vector<16x32xf32>
    %cst_120 = arith.constant 9.99999996E-13 : f32
    %321 = vector.broadcast %cst_120 : f32 to vector<16x1xf32>
    %322 = arith.addf %318, %321 : vector<16x1xf32>
    %323 = math.rsqrt %322 : vector<16x1xf32>
    %324 = vector.broadcast %323 : vector<16x1xf32> to vector<16x32xf32>
    %325 = arith.mulf %320, %324 : vector<16x32xf32>
    %326 = vector.broadcast %305 : vector<1x32xf32> to vector<16x32xf32>
    %327 = arith.mulf %325, %326 : vector<16x32xf32>
    %328 = vector.broadcast %307 : vector<1x32xf32> to vector<16x32xf32>
    %329 = arith.addf %327, %328 : vector<16x32xf32>
    %c1_121 = arith.constant 1 : index
    %c0_122 = arith.constant 0 : index
    %c0_123 = arith.constant 0 : index
    %330 = vector.load %arg11[%c1_121, %c0_122, %c0_123] : memref<2x32x64xbf16, #tpu.memory_space<vmem>>, vector<1x32x64xbf16>
    %331 = vector.shape_cast %330 : vector<1x32x64xbf16> to vector<32x64xbf16>
    %332 = arith.truncf %329 : vector<16x32xf32> to vector<16x32xbf16>
    %cst_124 = arith.constant dense<0.000000e+00> : vector<16x64xf32>
    %333 = tpu.matmul %332, %331, %cst_124 {dimension_numbers = #tpu.dot_dimension_numbers<[1], [0], [0], [1], [0, 0, 1, 1], [], []>} : vector<16x32xbf16>, vector<32x64xbf16>, vector<16x64xf32> -> vector<16x64xf32>
    %c1_125 = arith.constant 1 : index
    %c0_126 = arith.constant 0 : index
    %c0_127 = arith.constant 0 : index
    %334 = vector.load %arg12[%c1_125, %c0_126, %c0_127] : memref<2x1x64xf32, #tpu.memory_space<vmem>>, vector<1x1x64xf32>
    %335 = vector.shape_cast %334 : vector<1x1x64xf32> to vector<1x64xf32>
    %336 = vector.broadcast %335 : vector<1x64xf32> to vector<16x64xf32>
    %337 = arith.addf %333, %336 : vector<16x64xf32>
    %cst_128 = arith.constant 5.000000e-01 : f32
    %338 = vector.broadcast %cst_128 : f32 to vector<16x64xf32>
    %339 = arith.mulf %338, %337 : vector<16x64xf32>
    %cst_129 = arith.constant 4.471500e-02 : f32
    %340 = vector.broadcast %cst_129 : f32 to vector<16x64xf32>
    %341 = arith.mulf %340, %337 : vector<16x64xf32>
    %342 = arith.mulf %341, %337 : vector<16x64xf32>
    %343 = arith.mulf %342, %337 : vector<16x64xf32>
    %344 = arith.addf %337, %343 : vector<16x64xf32>
    %cst_130 = arith.constant 0.797884583 : f32
    %345 = vector.broadcast %cst_130 : f32 to vector<16x64xf32>
    %346 = arith.mulf %345, %344 : vector<16x64xf32>
    %347 = math.tanh %346 : vector<16x64xf32>
    %cst_131 = arith.constant 1.000000e+00 : f32
    %348 = vector.broadcast %cst_131 : f32 to vector<16x64xf32>
    %349 = arith.addf %348, %347 : vector<16x64xf32>
    %350 = arith.mulf %339, %349 : vector<16x64xf32>
    %c1_132 = arith.constant 1 : index
    %c0_133 = arith.constant 0 : index
    %c0_134 = arith.constant 0 : index
    %351 = vector.load %arg13[%c1_132, %c0_133, %c0_134] : memref<2x64x32xbf16, #tpu.memory_space<vmem>>, vector<1x64x32xbf16>
    %352 = vector.shape_cast %351 : vector<1x64x32xbf16> to vector<64x32xbf16>
    %353 = arith.truncf %350 : vector<16x64xf32> to vector<16x64xbf16>
    %cst_135 = arith.constant dense<0.000000e+00> : vector<16x32xf32>
    %354 = tpu.matmul %353, %352, %cst_135 {dimension_numbers = #tpu.dot_dimension_numbers<[1], [0], [0], [1], [0, 0, 1, 1], [], []>} : vector<16x64xbf16>, vector<64x32xbf16>, vector<16x32xf32> -> vector<16x32xf32>
    %c1_136 = arith.constant 1 : index
    %c0_137 = arith.constant 0 : index
    %c0_138 = arith.constant 0 : index
    %355 = vector.load %arg14[%c1_136, %c0_137, %c0_138] : memref<2x1x32xf32, #tpu.memory_space<vmem>>, vector<1x1x32xf32>
    %356 = vector.shape_cast %355 : vector<1x1x32xf32> to vector<1x32xf32>
    %357 = vector.broadcast %356 : vector<1x32xf32> to vector<16x32xf32>
    %358 = arith.addf %354, %357 : vector<16x32xf32>
    %359 = arith.addf %329, %358 : vector<16x32xf32>
    %c1_139 = arith.constant 1 : index
    %c0_140 = arith.constant 0 : index
    %c0_141 = arith.constant 0 : index
    %360 = vector.load %arg15[%c1_139, %c0_140, %c0_141] : memref<2x1x32xf32, #tpu.memory_space<vmem>>, vector<1x1x32xf32>
    %361 = vector.shape_cast %360 : vector<1x1x32xf32> to vector<1x32xf32>
    %c1_142 = arith.constant 1 : index
    %c0_143 = arith.constant 0 : index
    %c0_144 = arith.constant 0 : index
    %362 = vector.load %arg16[%c1_142, %c0_143, %c0_144] : memref<2x1x32xf32, #tpu.memory_space<vmem>>, vector<1x1x32xf32>
    %363 = vector.shape_cast %362 : vector<1x1x32xf32> to vector<1x32xf32>
    %cst_145 = arith.constant dense<0.000000e+00> : vector<16xf32>
    %364 = vector.multi_reduction <add>, %359, %cst_145 [1] : vector<16x32xf32> to vector<16xf32>
    %365 = vector.shape_cast %364 : vector<16xf32> to vector<16x1xf32>
    %cst_146 = arith.constant 3.200000e+01 : f32
    %366 = vector.broadcast %cst_146 : f32 to vector<16x1xf32>
    %367 = arith.divf %365, %366 : vector<16x1xf32>
    %368 = vector.broadcast %367 : vector<16x1xf32> to vector<16x32xf32>
    %369 = arith.subf %359, %368 : vector<16x32xf32>
    %370 = arith.mulf %369, %369 : vector<16x32xf32>
    %cst_147 = arith.constant dense<0.000000e+00> : vector<16xf32>
    %371 = vector.multi_reduction <add>, %370, %cst_147 [1] : vector<16x32xf32> to vector<16xf32>
    %372 = vector.shape_cast %371 : vector<16xf32> to vector<16x1xf32>
    %cst_148 = arith.constant 3.200000e+01 : f32
    %373 = vector.broadcast %cst_148 : f32 to vector<16x1xf32>
    %374 = arith.divf %372, %373 : vector<16x1xf32>
    %375 = vector.broadcast %367 : vector<16x1xf32> to vector<16x32xf32>
    %376 = arith.subf %359, %375 : vector<16x32xf32>
    %cst_149 = arith.constant 9.99999996E-13 : f32
    %377 = vector.broadcast %cst_149 : f32 to vector<16x1xf32>
    %378 = arith.addf %374, %377 : vector<16x1xf32>
    %379 = math.rsqrt %378 : vector<16x1xf32>
    %380 = vector.broadcast %379 : vector<16x1xf32> to vector<16x32xf32>
    %381 = arith.mulf %376, %380 : vector<16x32xf32>
    %382 = vector.broadcast %361 : vector<1x32xf32> to vector<16x32xf32>
    %383 = arith.mulf %381, %382 : vector<16x32xf32>
    %384 = vector.broadcast %363 : vector<1x32xf32> to vector<16x32xf32>
    %385 = arith.addf %383, %384 : vector<16x32xf32>
    %386 = vector.extract_strided_slice %385 {offsets = [0, 0], sizes = [1, 32], strides = [1, 1]} : vector<16x32xf32> to vector<1x32xf32>
    %387 = vector.extract_strided_slice %385 {offsets = [8, 0], sizes = [1, 32], strides = [1, 1]} : vector<16x32xf32> to vector<1x32xf32>
    %388 = tpu.concatenate %386, %387 in 0 : vector<1x32xf32>, vector<1x32xf32> -> vector<2x32xf32>
    %c0_150 = arith.constant 0 : index
    %c0_151 = arith.constant 0 : index
    %389 = vector.load %arg17[%c0_150, %c0_151] : memref<32x32xbf16, #tpu.memory_space<vmem>>, vector<32x32xbf16>
    %390 = arith.truncf %388 : vector<2x32xf32> to vector<2x32xbf16>
    %cst_152 = arith.constant dense<0.000000e+00> : vector<2x32xf32>
    %391 = tpu.matmul %390, %389, %cst_152 {dimension_numbers = #tpu.dot_dimension_numbers<[1], [0], [0], [1], [0, 0, 1, 1], [], []>} : vector<2x32xbf16>, vector<32x32xbf16>, vector<2x32xf32> -> vector<2x32xf32>
    %c0_153 = arith.constant 0 : index
    %c0_154 = arith.constant 0 : index
    %392 = vector.load %arg18[%c0_153, %c0_154] : memref<1x32xf32, #tpu.memory_space<vmem>>, vector<1x32xf32>
    %393 = vector.broadcast %392 : vector<1x32xf32> to vector<2x32xf32>
    %394 = arith.addf %391, %393 : vector<2x32xf32>
    %395 = math.tanh %394 : vector<2x32xf32>
    %c0_155 = arith.constant 0 : index
    %c0_156 = arith.constant 0 : index
    %396 = vector.load %arg19[%c0_155, %c0_156] : memref<32x3xbf16, #tpu.memory_space<vmem>>, vector<32x3xbf16>
    %397 = arith.truncf %395 : vector<2x32xf32> to vector<2x32xbf16>
    %cst_157 = arith.constant dense<0.000000e+00> : vector<2x3xf32>
    %398 = tpu.matmul %397, %396, %cst_157 {dimension_numbers = #tpu.dot_dimension_numbers<[1], [0], [0], [1], [0, 0, 1, 1], [], []>} : vector<2x32xbf16>, vector<32x3xbf16>, vector<2x3xf32> -> vector<2x3xf32>
    %c0_158 = arith.constant 0 : index
    %c0_159 = arith.constant 0 : index
    %399 = vector.load %arg20[%c0_158, %c0_159] : memref<1x3xf32, #tpu.memory_space<vmem>>, vector<1x3xf32>
    %400 = vector.broadcast %399 : vector<1x3xf32> to vector<2x3xf32>
    %401 = arith.addf %398, %400 : vector<2x3xf32>
    %c0_160 = arith.constant 0 : index
    %c0_161 = arith.constant 0 : index
    %402 = vector.load %arg22[%c0_160, %c0_161] : memref<2x32xf32, #tpu.memory_space<vmem>>, vector<2x32xf32>
    tpu.vector_store %arg22[%c0_160, %c0_161], %395 {strides = array<i32>} : memref<2x32xf32, #tpu.memory_space<vmem>>, vector<2x32xf32>,
    %c0_162 = arith.constant 0 : index
    %c0_163 = arith.constant 0 : index
    %403 = vector.load %arg21[%c0_162, %c0_163] : memref<2x3xf32, #tpu.memory_space<vmem>>, vector<2x3xf32>
    tpu.vector_store %arg21[%c0_162, %c0_163], %401 {strides = array<i32>} : memref<2x3xf32, #tpu.memory_space<vmem>>, vector<2x3xf32>,
    return
  }
  func.func @transform_0(%arg0: i32) -> (i32, i32) {
    %c0_i32 = arith.constant 0 : i32
    %c0_i32_0 = arith.constant 0 : i32
    %c0_i32_1 = arith.constant 0 : i32
    return %c0_i32, %c0_i32_0 : i32, i32
  }
  func.func @transform_1(%arg0: i32) -> (i32, i32) {
    %c0_i32 = arith.constant 0 : i32
    %c0_i32_0 = arith.constant 0 : i32
    %c0_i32_1 = arith.constant 0 : i32
    return %c0_i32, %c0_i32_0 : i32, i32
  }
  func.func @transform_2(%arg0: i32) -> (i32, i32) {
    %c0_i32 = arith.constant 0 : i32
    %c0_i32_0 = arith.constant 0 : i32
    %c0_i32_1 = arith.constant 0 : i32
    return %c0_i32, %c0_i32_0 : i32, i32
  }
  func.func @transform_3(%arg0: i32) -> (i32, i32) {
    %c0_i32 = arith.constant 0 : i32
    %c0_i32_0 = arith.constant 0 : i32
    %c0_i32_1 = arith.constant 0 : i32
    return %c0_i32, %c0_i32_0 : i32, i32
  }
  func.func @transform_4(%arg0: i32) -> (i32, i32, i32) {
    %c0_i32 = arith.constant 0 : i32
    %c0_i32_0 = arith.constant 0 : i32
    %c0_i32_1 = arith.constant 0 : i32
    %c0_i32_2 = arith.constant 0 : i32
    return %c0_i32, %c0_i32_0, %c0_i32_1 : i32, i32, i32
  }
  func.func @transform_5(%arg0: i32) -> (i32, i32, i32) {
    %c0_i32 = arith.constant 0 : i32
    %c0_i32_0 = arith.constant 0 : i32
    %c0_i32_1 = arith.constant 0 : i32
    %c0_i32_2 = arith.constant 0 : i32
    return %c0_i32, %c0_i32_0, %c0_i32_1 : i32, i32, i32
  }
  func.func @transform_6(%arg0: i32) -> (i32, i32, i32) {
    %c0_i32 = arith.constant 0 : i32
    %c0_i32_0 = arith.constant 0 : i32
    %c0_i32_1 = arith.constant 0 : i32
    %c0_i32_2 = arith.constant 0 : i32
    return %c0_i32, %c0_i32_0, %c0_i32_1 : i32, i32, i32
  }
  func.func @transform_7(%arg0: i32) -> (i32, i32, i32) {
    %c0_i32 = arith.constant 0 : i32
    %c0_i32_0 = arith.constant 0 : i32
    %c0_i32_1 = arith.constant 0 : i32
    %c0_i32_2 = arith.constant 0 : i32
    return %c0_i32, %c0_i32_0, %c0_i32_1 : i32, i32, i32
  }
  func.func @transform_8(%arg0: i32) -> (i32, i32, i32) {
    %c0_i32 = arith.constant 0 : i32
    %c0_i32_0 = arith.constant 0 : i32
    %c0_i32_1 = arith.constant 0 : i32
    %c0_i32_2 = arith.constant 0 : i32
    return %c0_i32, %c0_i32_0, %c0_i32_1 : i32, i32, i32
  }
  func.func @transform_9(%arg0: i32) -> (i32, i32, i32) {
    %c0_i32 = arith.constant 0 : i32
    %c0_i32_0 = arith.constant 0 : i32
    %c0_i32_1 = arith.constant 0 : i32
    %c0_i32_2 = arith.constant 0 : i32
    return %c0_i32, %c0_i32_0, %c0_i32_1 : i32, i32, i32
  }
  func.func @transform_10(%arg0: i32) -> (i32, i32, i32) {
    %c0_i32 = arith.constant 0 : i32
    %c0_i32_0 = arith.constant 0 : i32
    %c0_i32_1 = arith.constant 0 : i32
    %c0_i32_2 = arith.constant 0 : i32
    return %c0_i32, %c0_i32_0, %c0_i32_1 : i32, i32, i32
  }
  func.func @transform_11(%arg0: i32) -> (i32, i32, i32) {
    %c0_i32 = arith.constant 0 : i32
    %c0_i32_0 = arith.constant 0 : i32
    %c0_i32_1 = arith.constant 0 : i32
    %c0_i32_2 = arith.constant 0 : i32
    return %c0_i32, %c0_i32_0, %c0_i32_1 : i32, i32, i32
  }
  func.func @transform_12(%arg0: i32) -> (i32, i32, i32) {
    %c0_i32 = arith.constant 0 : i32
    %c0_i32_0 = arith.constant 0 : i32
    %c0_i32_1 = arith.constant 0 : i32
    %c0_i32_2 = arith.constant 0 : i32
    return %c0_i32, %c0_i32_0, %c0_i32_1 : i32, i32, i32
  }
  func.func @transform_13(%arg0: i32) -> (i32, i32, i32) {
    %c0_i32 = arith.constant 0 : i32
    %c0_i32_0 = arith.constant 0 : i32
    %c0_i32_1 = arith.constant 0 : i32
    %c0_i32_2 = arith.constant 0 : i32
    return %c0_i32, %c0_i32_0, %c0_i32_1 : i32, i32, i32
  }
  func.func @transform_14(%arg0: i32) -> (i32, i32, i32) {
    %c0_i32 = arith.constant 0 : i32
    %c0_i32_0 = arith.constant 0 : i32
    %c0_i32_1 = arith.constant 0 : i32
    %c0_i32_2 = arith.constant 0 : i32
    return %c0_i32, %c0_i32_0, %c0_i32_1 : i32, i32, i32
  }
  func.func @transform_15(%arg0: i32) -> (i32, i32, i32) {
    %c0_i32 = arith.constant 0 : i32
    %c0_i32_0 = arith.constant 0 : i32
    %c0_i32_1 = arith.constant 0 : i32
    %c0_i32_2 = arith.constant 0 : i32
    return %c0_i32, %c0_i32_0, %c0_i32_1 : i32, i32, i32
  }
  func.func @transform_16(%arg0: i32) -> (i32, i32) {
    %c0_i32 = arith.constant 0 : i32
    %c0_i32_0 = arith.constant 0 : i32
    %c0_i32_1 = arith.constant 0 : i32
    return %c0_i32, %c0_i32_0 : i32, i32
  }
  func.func @transform_17(%arg0: i32) -> (i32, i32) {
    %c0_i32 = arith.constant 0 : i32
    %c0_i32_0 = arith.constant 0 : i32
    %c0_i32_1 = arith.constant 0 : i32
    return %c0_i32, %c0_i32_0 : i32, i32
  }
  func.func @transform_18(%arg0: i32) -> (i32, i32) {
    %c0_i32 = arith.constant 0 : i32
    %c0_i32_0 = arith.constant 0 : i32
    %c0_i32_1 = arith.constant 0 : i32
    return %c0_i32, %c0_i32_0 : i32, i32
  }
  func.func @transform_19(%arg0: i32) -> (i32, i32) {
    %c0_i32 = arith.constant 0 : i32
    %c0_i32_0 = arith.constant 0 : i32
    %c0_i32_1 = arith.constant 0 : i32
    return %c0_i32, %c0_i32_0 : i32, i32
  }
  func.func @transform_20(%arg0: i32) -> (i32, i32) {
    %c0_i32 = arith.constant 0 : i32
    %c0_i32_0 = arith.constant 0 : i32
    %c0_i32_1 = arith.constant 0 : i32
    return %c0_i32, %c0_i32_0 : i32, i32
  }
  func.func @transform_21(%arg0: i32) -> (i32, i32) {
    %c0_i32 = arith.constant 0 : i32
    %c0_i32_0 = arith.constant 0 : i32
    %c0_i32_1 = arith.constant 0 : i32
    return %c0_i32, %c0_i32_0 : i32, i32
  }
}

</mosaic_0001>

<bundles_post_ra>
// kernel: mul.32
= control target key start
LH: loop header
LB: loop body
LE: loop exit
PB: predicated region body
PF: predicated region fallthrough
CT: control target
= control target key end

     0   :  { %vm8_vm0 = vcmask 64512   ;;  %vm14_vm1 = vcmask 130112   ;;  %s42_s0 = inlined_call_operand.vmem [shape: f32[2,8], index: 0, kind: input, shape index: {}]   ;;  %s43_s1 = inlined_call_operand.vmem [shape: f32[16], index: 1, kind: output, shape index: {}]  }
   0x1   :  { %v5_v0 = vld [vmem:[%s42_s0] sm:$0x3]  ;;  %s25_s0 = smov 8  }
   0x2   :  { %6 = vst [vmem:[#allocation1] sm:$0x3] %v5_v0 }
   0x9   :  { %v11_v1 = vld [vmem:[#allocation1 + $0x1] sm:$0x1]   ;;  %v7_v2 = vld [vmem:[#allocation1] sm:$0x1]  }
   0xa   :  { %12 = vrot.lane.b32.xlu0 %v11_v1, %s25_s0  ;;  %9 = vst.msk [vmem:[#allocation0] sm:$0x1] %vm8_vm0, %v7_v2  }
  0x7c   :  { %v13_v3 = vpop.permute.xlu0 %12  }
  0x7d   :  { %15 = vst.msk [vmem:[#allocation0] sm:$0x1] %vm14_vm1, %v13_v3  }
  0x84   :  { %v20_v4 = vld [vmem:[#allocation0] sm:$0x1] }
  0x85   :  { %23 = vst [vmem:[%s43_s1] sm:$0x1] %v20_v4 }

// kernel: bert_seq_clf_forward.1
= control target key start
LH: loop header
LB: loop body
LE: loop exit
PB: predicated region body
PF: predicated region fallthrough
CT: control target
= control target key end

     0   :  { %s3250_s0 = inlined_call_operand.vmem [shape: f32[16,32], index: 0, kind: input, shape index: {}]   ;;  %s3251_s1 = inlined_call_operand.vmem [shape: f32[16,16], index: 1, kind: input, shape index: {}]   ;;  %s3252_s2 = inlined_call_operand.vmem [shape: f32[1,32], index: 2, kind: input, shape index: {}]   ;;  %s3253_s3 = inlined_call_operand.vmem [shape: f32[1,32], index: 3, kind: input, shape index: {}]   ;;  %s3254_s4 = inlined_call_operand.vmem [shape: bf16[2,32,96], index: 4, kind: input, shape index: {}]   ;;  %s3255_s5 = inlined_call_operand.vmem [shape: f32[2,1,96], index: 5, kind: input, shape index: {}]   ;;  %s3256_s6 = inlined_call_operand.vmem [shape: bf16[2,32,32], index: 6, kind: input, shape index: {}]   ;;  %s3257_s7 = inlined_call_operand.vmem [shape: f32[2,1,32], index: 7, kind: input, shape index: {}]   ;;  %s3258_s8 = inlined_call_operand.vmem [shape: f32[2,1,32], index: 8, kind: input, shape index: {}]   ;;  %s3259_s9 = inlined_call_operand.vmem [shape: f32[2,1,32], index: 9, kind: input, shape index: {}]   ;;  %s3260_s10 = inlined_call_operand.vmem [shape: bf16[2,32,64], index: 10, kind: input, shape index: {}]   ;;  %s3261_s11 = inlined_call_operand.vmem [shape: f32[2,1,64], index: 11, kind: input, shape index: {}]   ;;  %s3262_s12 = inlined_call_operand.vmem [shape: bf16[2,64,32], index: 12, kind: input, shape index: {}]   ;;  %s3263_s13 = inlined_call_operand.vmem [shape: f32[2,1,32], index: 13, kind: input, shape index: {}]   ;;  %s3264_s14 = inlined_call_operand.vmem [shape: f32[2,1,32], index: 14, kind: input, shape index: {}]   ;;  %s3265_s15 = inlined_call_operand.vmem [shape: f32[2,1,32], index: 15, kind: input, shape index: {}]   ;;  %s3266_s16 = inlined_call_operand.vmem [shape: bf16[32,32], index: 16, kind: input, shape index: {}]   ;;  %s3267_s17 = inlined_call_operand.vmem [shape: f32[1,32], index: 17, kind: input, shape index: {}]   ;;  %s3268_s18 = inlined_call_operand.vmem [shape: bf16[32,3], index: 18, kind: input, shape index: {}]   ;;  %s3269_s19 = inlined_call_operand.vmem [shape: f32[1,3], index: 19, kind: input, shape index: {}]   ;;  %s3270_s20 = inlined_call_operand.hbm [shape: f32[2,3], index: 20, kind: output, shape index: {0}]   ;;  %s3271_s21 = inlined_call_operand.hbm [shape: f32[2,32], index: 21, kind: output, shape index: {1}]  }
   0x1   :  { %3285 = sst [smem:[#allocation8_spill]] %s3250_s0 }
   0x2   :  { %3286 = sst [smem:[#allocation9_spill]] %s3251_s1 }
   0x3   :  { %3287 = sst [smem:[#allocation10_spill]] %s3252_s2 }
   0x4   :  { %3288 = sst [smem:[#allocation11_spill]] %s3253_s3 }
   0x5   :  { %3289 = sst [smem:[#allocation12_spill]] %s3254_s4 }
   0x6   :  { %3290 = sst [smem:[#allocation13_spill]] %s3255_s5 }
   0x7   :  { %27 = vsyncpa [#allocation3], 0  ;;  %s3291_s26 = sld [smem:[#allocation8_spill]]  ;;  %vm74_vm0 = vcmask 261120  }
   0xd   :  { %v70_v0 = vld [vmem:[%s3291_s26] sm:$0xff]  ;;  %v71_v1 = vld [vmem:[%s3291_s26 + $0x8] sm:$0xff] }
   0xe   :  { %v75_v2 = vsel %vm74_vm0, %v70_v0, 0.0  ;;  %v78_v3 = vsel %vm74_vm0, %v71_v1, 0.0 }
   0xf   :  { %76 = vadd.xlane.f32.xlu0 %v75_v2 }
  0x13   :  { %79 = vadd.xlane.f32.xlu0 %v78_v3 }
  0x14   :  { %28 = vsyncpa [#allocation5], 0  ;;  %s3292_s0 = sld [smem:[#allocation12_spill]]  ;;  %v2690_v15 = vmov 0.0   ;;  %vm2691_vm1 = vmmov 0   ;;  %s2692_s3 = smov 88  }
  0x15   :  { %2296 = vmatprep.subr.bf16.mxu0 %v2690_v15  ;;  %2300 = vmatprep.mubr.msk.bf16.mxu0 %vm2691_vm1, %v2690_v15  ;;  %s3293_s23 = sld [smem:[#allocation10_spill]]  ;;  %s2693_s28 = smov 96   ;;  %vm192_vm2 = vcmask 64512   ;;  %vm240_vm3 = vcmask 130048   ;;  %vm702_vm4 = vcmask 195584   ;;  %vm945_vm5 = vcmask 523264  }
  0x16   :  { %2304 = vmatprep.subr.bf16.mxu1 %v2690_v15  ;;  %2306 = vmatprep.mubr.msk.bf16.mxu1 %vm2691_vm1, %v2690_v15  ;;  %s3294_s2 = sld [smem:[#allocation11_spill]]  ;;  %s2694_s29 = smov 120   ;;  %vm1963_vm6 = vcmask 1040384   ;;  %vm2100_vm7 = vcmask 254976  }
  0x17   :  { %s3295_s27 = sld [smem:[#allocation13_spill]]  ;;  %s2695_s4 = smov 112  }
  0x18   :  { %s2696_s30 = smov 80   ;;  %s3284_s5 = smov 104  }
  0x19   :  { %s3283_s22 = smov 72   ;;  %s3296_s24 = sld [smem:[#allocation9_spill]] }
  0x1a   :  { %v2528_v14 = vld [vmem:[%s3292_s0 + $0x8] sm:$0xff]   ;;  %v2529_v16 = vld [vmem:[%s3292_s0] sm:$0xff]   ;;  %s3282_s26 = smov 64   ;;  %s3277_s1 = smov 40  }
  0x1b   :  { %2297 = vmatpush3.bf16.msra.mxu0 %v2528_v14  ;;  %v2132_v25 = vld [vmem:[%s3293_s23] ss:$0 sm:$0xff]  ;;  %s3278_s23 = smov 48   ;;  %s3279_s25 = smov 24  }
  0x1c   :  { %2298 = vmatprep.subr.bf16.mxu0 %v2690_v15  ;;  %v2133_v29 = vld [vmem:[%s3294_s2] ss:$0 sm:$0xff]  ;;  %s3280_s2 = smov 16  }
  0x1d   :  { %v2134_v35 = vld [vmem:[%s3295_s27] ss:$0 sm:$0xff] }
  0x1f   :  { %2299 = vmatpush3.bf16.msra.mxu0 %v2529_v16  ;;  %v2900_v53 = vld [vmem:[%s3296_s24] sm:$0xff]  ;;  %v2906_v57 = vld [vmem:[%s3296_s24 + $0x8] sm:$0xff]  ;;  %s3276_s24 = smov 56  }
  0x20   :  { %2310 = vmatprep.subr.bf16.mxu0 %v2690_v15 }
  0x98   :  { %v77_v4 = vpop.xlane.xlu0 %76 }
  0x99   :  { %v82_v5 = vmul.f32 0.03125, %v77_v4 }
  0x9b   :  { %v84_v6 = vsub.f32 %v70_v0, %v82_v5 }
  0x9c   :  { %v80_v7 = vpop.xlane.xlu0 %79 }
  0x9d   :  { %v83_v8 = vmul.f32 0.03125, %v80_v7  ;;  %v86_v9 = vmul.f32 %v84_v6, %v84_v6 }
  0x9f   :  { %v85_v10 = vsub.f32 %v71_v1, %v83_v8  ;;  %v88_v11 = vsel %vm74_vm0, %v86_v9, 0.0 }
  0xa0   :  { %89 = vadd.xlane.f32.xlu1 %v88_v11 }
  0xa1   :  { %v87_v12 = vmul.f32 %v85_v10, %v85_v10 }
  0xa3   :  { %v91_v13 = vsel %vm74_vm0, %v87_v12, 0.0 }
  0xa4   :  { %92 = vadd.xlane.f32.xlu1 %v91_v13 }
 0x129   :  { %v90_v17 = vpop.xlane.xlu1 %89 }
 0x12a   :  { %v94_v18 = vmul.f32 0.03125, %v90_v17 }
 0x12c   :  { %v96_v19 = vadd.f32 1e-12, %v94_v18 }
 0x12d   :  { %v93_v20 = vpop.xlane.xlu1 %92 }
 0x12e   :  { %2552 = vrsqrt.f32 %v96_v19  ;;  %v95_v21 = vmul.f32 0.03125, %v93_v20 }
 0x130   :  { %v97_v22 = vadd.f32 1e-12, %v95_v21 }
 0x132   :  { %2554 = vrsqrt.f32 %v97_v22 }
 0x13b   :  { %v2553_v23 = vpop.eup %2552 }
 0x13c   :  { %v100_v24 = vmul.f32 %v2553_v23, %v84_v6 }
 0x13e   :  { %v108_v28 = vmul.f32 %v2132_v25, %v100_v24 }
 0x13f   :  { %v2555_v26 = vpop.eup %2554 }
 0x140   :  { %v101_v27 = vmul.f32 %v2555_v26, %v85_v10  ;;  %v2848_v31 = vadd.f32 %v2133_v29, %v108_v28 }
 0x142   :  { %v109_v30 = vmul.f32 %v2132_v25, %v101_v27 }
 0x144   :  { %v2850_v32 = vadd.f32 %v2133_v29, %v109_v30 }
 0x146   :  { %v124_v33 = vpack.c.bf16 %v2850_v32, %v2848_v31 }
 0x148   :  { %2301 = vmatmul.mubr.msk.bf16.vlgmr.msra.gmra.mxu0 %vm74_vm0, %v124_v33 }
 0x149   :  { %2312 = vmatprep.mubr.msk.bf16.mxu0 %vm2691_vm1, %v2690_v15 }
 0x208   :  { %v181_v34 = vpop.f32.mrf.mxu0 }
 0x209   :  { %v182_v38 = vadd.f32 %v2134_v35, %v181_v34 }
 0x20a   :  { %v2302_v36 = vpop.f32.mrf.mxu0 }
 0x20c   :  { %v184_v37 = vpop.f32.mrf.mxu0 }
 0x20d   :  { %v185_v39 = vadd.f32 %v2134_v35, %v184_v37 }
 0x20e   :  { %v2303_v40 = vpop.f32.mrf.mxu0 }
 0x20f   :  { %v2860_v41 = vpack.c.bf16 %v185_v39, %v182_v38 }
 0x211   :  { %313 = vrot.lane.b32.xlu1 %v2860_v41, %s2692_s3  ;;  %190 = vrot.lane.b32.xlu0 %v2860_v41, %s2693_s28 }
 0x215   :  { %311 = vrot.lane.b32.xlu1 %v2860_v41, %s2694_s29  ;;  %432 = vrot.lane.b32.xlu0 %v2860_v41, %s2695_s4 }
 0x219   :  { %434 = vrot.lane.b32.xlu1 %v2860_v41, %s2696_s30  ;;  %553 = vrot.lane.b32.xlu0 %v2860_v41, %s3284_s5  ;;  %s3305_s5 = smov 24  }
 0x21d   :  { %555 = vrot.lane.b32.xlu1 %v2860_v41, %s3283_s22 }
 0x283   :  { %v191_v42 = vpop.permute.xlu0 %190  ;;  %v314_v44 = vpop.permute.xlu1 %313 }
 0x284   :  { %v197_v43 = vsel %vm192_vm2, %v191_v42, 0  ;;  %v319_v46 = vsel %vm192_vm2, %v314_v44, 0 }
 0x285   :  { %2305 = vmatpush3.bf16.xpose.msra.mxu1 %v197_v43 }
 0x286   :  { %2316 = vmatprep.subr.bf16.mxu1 %v2690_v15 }
 0x287   :  { %v312_v45 = vpop.permute.xlu1 %311  ;;  %v433_v50 = vpop.permute.xlu0 %432 }
 0x28b   :  { %v435_v47 = vpop.permute.xlu1 %434  ;;  %v554_v52 = vpop.permute.xlu0 %553 }
 0x28c   :  { %2307 = vmatmul.mubr.msk.bf16.vlgmr.msra.gmra.mxu1 %vm192_vm2, %v2860_v41  ;;  %v440_v48 = vsel %vm192_vm2, %v435_v47, 0 }
 0x28d   :  { %2317 = vmatpush3.bf16.xpose.msra.mxu1 %v319_v46  ;;  %2318 = vmatprep.mubr.msk.bf16.mxu1 %vm2691_vm1, %v2690_v15 }
 0x28e   :  { %2328 = vmatprep.subr.bf16.mxu1 %v2690_v15 }
 0x28f   :  { %v556_v49 = vpop.permute.xlu1 %555 }
 0x290   :  { %v561_v51 = vsel %vm192_vm2, %v556_v49, 0 }
 0x294   :  { %2319 = vmatmul.mubr.msk.bf16.vlgmr.msra.gmra.mxu1 %vm192_vm2, %v312_v45 }
 0x295   :  { %2329 = vmatpush3.bf16.xpose.msra.mxu1 %v440_v48  ;;  %2330 = vmatprep.mubr.msk.bf16.mxu1 %vm2691_vm1, %v2690_v15 }
 0x296   :  { %2340 = vmatprep.subr.bf16.mxu1 %v2690_v15 }
 0x29c   :  { %2331 = vmatmul.mubr.msk.bf16.vlgmr.msra.gmra.mxu1 %vm192_vm2, %v433_v50 }
 0x29d   :  { %2341 = vmatpush3.bf16.xpose.msra.mxu1 %v561_v51  ;;  %2342 = vmatprep.mubr.msk.bf16.mxu1 %vm2691_vm1, %v2690_v15 }
 0x29e   :  { %2352 = vmatprep.subr.bf16.mxu1 %v2690_v15 }
 0x2a4   :  { %2343 = vmatmul.mubr.msk.bf16.vlgmr.msra.gmra.mxu1 %vm192_vm2, %v554_v52 }
 0x2a5   :  { %2356 = vmatprep.mubr.msk.bf16.mxu1 %vm2691_vm1, %v2690_v15 }
 0x34c   :  { %v233_v54 = vpop.f32.mrf.mxu1 }
 0x34d   :  { %v234_v55 = vadd.f32 %v233_v54, %v2900_v53 }
 0x34e   :  { %v2308_v56 = vpop.f32.mrf.mxu1 }
 0x34f   :  { %v241_v58 = vsel %vm240_vm3, %v234_v55, -inf }
 0x350   :  { %242 = vmax.xlane.f32.xlu1 %v241_v58  ;;  %v236_v59 = vpop.f32.mrf.mxu1 }
 0x351   :  { %v237_v60 = vadd.f32 %v236_v59, %v2906_v57 }
 0x352   :  { %v2309_v61 = vpop.f32.mrf.mxu1 }
 0x353   :  { %v244_v62 = vsel %vm240_vm3, %v237_v60, -inf }
 0x354   :  { %245 = vmax.xlane.f32.xlu0 %v244_v62  ;;  %v355_v63 = vpop.f32.mrf.mxu1 }
 0x355   :  { %v356_v0 = vadd.f32 %v355_v63, %v2900_v53 }
 0x356   :  { %v2320_v1 = vpop.f32.mrf.mxu1 }
 0x357   :  { %v362_v2 = vsel %vm240_vm3, %v356_v0, -inf }
 0x358   :  { %363 = vmax.xlane.f32.xlu0 %v362_v2  ;;  %v358_v3 = vpop.f32.mrf.mxu1 }
 0x359   :  { %v359_v4 = vadd.f32 %v358_v3, %v2906_v57 }
 0x35a   :  { %v2321_v5 = vpop.f32.mrf.mxu1 }
 0x35b   :  { %v365_v6 = vsel %vm240_vm3, %v359_v4, -inf }
 0x35c   :  { %366 = vmax.xlane.f32.xlu0 %v365_v6  ;;  %v476_v7 = vpop.f32.mrf.mxu1 }
 0x35d   :  { %v477_v8 = vadd.f32 %v476_v7, %v2900_v53 }
 0x35e   :  { %v2332_v9 = vpop.f32.mrf.mxu1 }
 0x35f   :  { %v483_v10 = vsel %vm240_vm3, %v477_v8, -inf }
 0x360   :  { %484 = vmax.xlane.f32.xlu1 %v483_v10  ;;  %v479_v11 = vpop.f32.mrf.mxu1 }
 0x361   :  { %v480_v12 = vadd.f32 %v479_v11, %v2906_v57 }
 0x362   :  { %v2333_v13 = vpop.f32.mrf.mxu1 }
 0x363   :  { %v486_v14 = vsel %vm240_vm3, %v480_v12, -inf }
 0x364   :  { %487 = vmax.xlane.f32.xlu0 %v486_v14  ;;  %v597_v16 = vpop.f32.mrf.mxu1 }
 0x365   :  { %v598_v17 = vadd.f32 %v597_v16, %v2900_v53 }
 0x366   :  { %v2344_v18 = vpop.f32.mrf.mxu1 }
 0x367   :  { %v604_v19 = vsel %vm240_vm3, %v598_v17, -inf }
 0x368   :  { %605 = vmax.xlane.f32.xlu1 %v604_v19  ;;  %v600_v20 = vpop.f32.mrf.mxu1 }
 0x369   :  { %v601_v21 = vadd.f32 %v600_v20, %v2906_v57 }
 0x36a   :  { %v2345_v22 = vpop.f32.mrf.mxu1 }
 0x36b   :  { %v607_v23 = vsel %vm240_vm3, %v601_v21, -inf }
 0x36c   :  { %608 = vmax.xlane.f32.xlu0 %v607_v23 }
 0x379   :  { %264 = vrot.lane.b32.xlu1 %v2860_v41, %s3282_s26 }
 0x3d9   :  { %v243_v24 = vpop.xlane.xlu1 %242 }
 0x3da   :  { %v247_v25 = vsub.f32 %v234_v55, %v243_v24 }
 0x3dc   :  { %v249_v26 = vmul.f32 1.442695, %v247_v25 }
 0x3dd   :  { %v246_v27 = vpop.xlane.xlu0 %245 }
 0x3de   :  { %2556 = vpow2.f32 %v249_v26  ;;  %v248_v28 = vsub.f32 %v237_v60, %v246_v27 }
 0x3e0   :  { %v251_v29 = vmul.f32 1.442695, %v248_v28 }
 0x3e1   :  { %v364_v30 = vpop.xlane.xlu0 %363 }
 0x3e2   :  { %2558 = vpow2.f32 %v251_v29  ;;  %v368_v33 = vsub.f32 %v356_v0, %v364_v30 }
 0x3e4   :  { %v370_v34 = vmul.f32 1.442695, %v368_v33 }
 0x3e5   :  { %v367_v35 = vpop.xlane.xlu0 %366 }
 0x3e6   :  { %2560 = vpow2.f32 %v370_v34  ;;  %v369_v36 = vsub.f32 %v359_v4, %v367_v35 }
 0x3e8   :  { %v372_v37 = vmul.f32 1.442695, %v369_v36 }
 0x3e9   :  { %v485_v38 = vpop.xlane.xlu1 %484 }
 0x3ea   :  { %2562 = vpow2.f32 %v372_v37  ;;  %v489_v39 = vsub.f32 %v477_v8, %v485_v38 }
 0x3eb   :  { %v2557_v40 = vpop.eup %2556 }
 0x3ec   :  { %v491_v42 = vmul.f32 1.442695, %v489_v39  ;;  %v253_v43 = vsel %vm240_vm3, %v2557_v40, 0.0 }
 0x3ed   :  { %254 = vadd.xlane.f32.xlu1 %v253_v43  ;;  %v488_v44 = vpop.xlane.xlu0 %487 }
 0x3ee   :  { %2564 = vpow2.f32 %v491_v42  ;;  %v490_v45 = vsub.f32 %v480_v12, %v488_v44 }
 0x3ef   :  { %v2559_v46 = vpop.eup %2558 }
 0x3f0   :  { %v493_v47 = vmul.f32 1.442695, %v490_v45  ;;  %v256_v48 = vsel %vm240_vm3, %v2559_v46, 0.0 }
 0x3f1   :  { %v606_v49 = vpop.xlane.xlu1 %605  ;;  %257 = vadd.xlane.f32.xlu0 %v256_v48 }
 0x3f2   :  { %2566 = vpow2.f32 %v493_v47  ;;  %v610_v50 = vsub.f32 %v598_v17, %v606_v49  ;;  %v2530_v47 = vld [vmem:[%s3256_s6 + $0x8] sm:$0xff]  }
 0x3f3   :  { %v2561_v51 = vpop.eup %2560  ;;  %2353 = vmatpush3.bf16.msra.mxu1 %v2530_v47  ;;  %v2150_v47 = vld [vmem:[%s3258_s8] ss:$0 sm:$0xff] }
 0x3f4   :  { %v612_v52 = vmul.f32 1.442695, %v610_v50  ;;  %v374_v54 = vsel %vm240_vm3, %v2561_v51, 0.0  ;;  %2354 = vmatprep.subr.bf16.mxu1 %v2690_v15 }
 0x3f5   :  { %v265_v55 = vpop.permute.xlu1 %264  ;;  %375 = vadd.xlane.f32.xlu1 %v374_v54  ;;  %v609_v56 = vpop.xlane.xlu0 %608 }
 0x3f6   :  { %2568 = vpow2.f32 %v612_v52  ;;  %v611_v58 = vsub.f32 %v601_v21, %v609_v56  ;;  %2311 = vmatpush3.bf16.msra.mxu0 %v265_v55  ;;  %v2531_v52 = vld [vmem:[%s3256_s6] sm:$0xff]  }
 0x3f7   :  { %v2563_v59 = vpop.eup %2562  ;;  %2322 = vmatprep.subr.bf16.mxu0 %v2690_v15  ;;  %2355 = vmatpush3.bf16.msra.mxu1 %v2531_v52 }
 0x3f8   :  { %v614_v60 = vmul.f32 1.442695, %v611_v58  ;;  %v377_v61 = vsel %vm240_vm3, %v2563_v59, 0.0  ;;  %2368 = vmatprep.subr.bf16.mxu1 %v2690_v15 }
 0x3f9   :  { %378 = vadd.xlane.f32.xlu0 %v377_v61 }
 0x3fa   :  { %2570 = vpow2.f32 %v614_v60 }
 0x3fb   :  { %v2565_v62 = vpop.eup %2564 }
 0x3fc   :  { %v495_v63 = vsel %vm240_vm3, %v2565_v62, 0.0 }
 0x3fd   :  { %496 = vadd.xlane.f32.xlu1 %v495_v63 }
 0x3ff   :  { %v2567_v0 = vpop.eup %2566 }
 0x400   :  { %v498_v1 = vsel %vm240_vm3, %v2567_v0, 0.0 }
 0x401   :  { %499 = vadd.xlane.f32.xlu0 %v498_v1 }
 0x403   :  { %v2569_v2 = vpop.eup %2568 }
 0x404   :  { %v616_v3 = vsel %vm240_vm3, %v2569_v2, 0.0 }
 0x405   :  { %617 = vadd.xlane.f32.xlu1 %v616_v3 }
 0x407   :  { %v2571_v4 = vpop.eup %2570 }
 0x408   :  { %v619_v5 = vsel %vm240_vm3, %v2571_v4, 0.0 }
 0x409   :  { %620 = vadd.xlane.f32.xlu0 %v619_v5 }
 0x416   :  { %506 = vrot.lane.b32.xlu1 %v2860_v41, %s3278_s23 }
 0x41a   :  { %627 = vrot.lane.b32.xlu1 %v2860_v41, %s3277_s1  ;;  %s3298_s1 = smov 72  }
 0x41f   :  { %385 = vrot.lane.b32.xlu0 %v2860_v41, %s3276_s24  ;;  %s3281_s24 = smov 8  }
 0x476   :  { %v255_v6 = vpop.xlane.xlu1 %254 }
 0x477   :  { %2572 = vrcp.f32 %v255_v6 }
 0x47a   :  { %v258_v7 = vpop.xlane.xlu0 %257 }
 0x47b   :  { %2574 = vrcp.f32 %v258_v7 }
 0x47e   :  { %v376_v9 = vpop.xlane.xlu1 %375 }
 0x482   :  { %v379_v8 = vpop.xlane.xlu0 %378 }
 0x483   :  { %2576 = vrcp.f32 %v379_v8 }
 0x484   :  { %v2573_v10 = vpop.eup %2572  ;;  %2578 = vrcp.f32 %v376_v9 }
 0x485   :  { %v261_v12 = vmul.f32 %v2573_v10, %v2557_v40 }
 0x486   :  { %v497_v16 = vpop.xlane.xlu1 %496 }
 0x488   :  { %v2575_v11 = vpop.eup %2574 }
 0x489   :  { %v262_v13 = vmul.f32 %v2575_v11, %v2559_v46 }
 0x48a   :  { %v500_v14 = vpop.xlane.xlu0 %499 }
 0x48b   :  { %v263_v17 = vpack.c.bf16 %v262_v13, %v261_v12  ;;  %2580 = vrcp.f32 %v500_v14 }
 0x48c   :  { %2582 = vrcp.f32 %v497_v16  ;;  %v2146_v16 = vld [vmem:[%s3257_s7] ss:$0 sm:$0xff] }
 0x48d   :  { %2313 = vmatmul.mubr.msk.bf16.vlgmr.msra.gmra.mxu0 %vm240_vm3, %v263_v17 }
 0x48e   :  { %2324 = vmatprep.mubr.msk.bf16.mxu0 %vm2691_vm1, %v2690_v15  ;;  %v618_v20 = vpop.xlane.xlu1 %617 }
 0x490   :  { %v2577_v41 = vpop.eup %2576 }
 0x491   :  { %v2579_v19 = vpop.eup %2578  ;;  %v383_v21 = vmul.f32 %v2577_v41, %v2563_v59 }
 0x492   :  { %v621_v18 = vpop.xlane.xlu0 %620  ;;  %v382_v23 = vmul.f32 %v2579_v19, %v2561_v51  ;;  %v507_v26 = vpop.permute.xlu1 %506 }
 0x493   :  { %2584 = vrcp.f32 %v621_v18 }
 0x494   :  { %2586 = vrcp.f32 %v618_v20  ;;  %v384_v24 = vpack.c.bf16 %v383_v21, %v382_v23 }
 0x496   :  { %v386_v22 = vpop.permute.xlu0 %385  ;;  %v628_v34 = vpop.permute.xlu1 %627 }
 0x497   :  { %2323 = vmatpush3.bf16.msra.mxu0 %v386_v22 }
 0x498   :  { %2334 = vmatprep.subr.bf16.mxu0 %v2690_v15  ;;  %v2581_v25 = vpop.eup %2580 }
 0x499   :  { %v2583_v27 = vpop.eup %2582  ;;  %v504_v28 = vmul.f32 %v2581_v25, %v2567_v0 }
 0x49a   :  { %2325 = vmatmul.mubr.msk.bf16.vlgmr.msra.gmra.mxu0 %vm240_vm3, %v384_v24  ;;  %v503_v29 = vmul.f32 %v2583_v27, %v2565_v62 }
 0x49b   :  { %2335 = vmatpush3.bf16.msra.mxu0 %v507_v26  ;;  %2336 = vmatprep.mubr.msk.bf16.mxu0 %vm2691_vm1, %v2690_v15 }
 0x49c   :  { %2346 = vmatprep.subr.bf16.mxu0 %v2690_v15  ;;  %v505_v30 = vpack.c.bf16 %v504_v28, %v503_v29 }
 0x4a0   :  { %v2585_v33 = vpop.eup %2584 }
 0x4a1   :  { %v2587_v35 = vpop.eup %2586  ;;  %v625_v36 = vmul.f32 %v2585_v33, %v2571_v4 }
 0x4a2   :  { %2337 = vmatmul.mubr.msk.bf16.vlgmr.msra.gmra.mxu0 %vm240_vm3, %v505_v30  ;;  %v624_v37 = vmul.f32 %v2587_v35, %v2569_v2 }
 0x4a3   :  { %2347 = vmatpush3.bf16.msra.mxu0 %v628_v34  ;;  %2348 = vmatprep.mubr.msk.bf16.mxu0 %vm2691_vm1, %v2690_v15 }
 0x4a4   :  { %2360 = vmatprep.subr.bf16.mxu0 %v2690_v15  ;;  %v626_v38 = vpack.c.bf16 %v625_v36, %v624_v37  ;;  %v2533_v37 = vld [vmem:[%s3260_s10] sm:$0xff]  }
 0x4aa   :  { %2349 = vmatmul.mubr.msk.bf16.vlgmr.msra.gmra.mxu0 %vm240_vm3, %v626_v38 }
 0x4ab   :  { %2364 = vmatprep.mubr.msk.bf16.mxu0 %vm2691_vm1, %v2690_v15 }
 0x54d   :  { %v304_v39 = vpop.f32.mrf.mxu0 }
 0x54f   :  { %v2314_v40 = vpop.f32.mrf.mxu0 }
 0x551   :  { %v307_v42 = vpop.f32.mrf.mxu0 }
 0x553   :  { %v2315_v43 = vpop.f32.mrf.mxu0 }
 0x55a   :  { %v425_v44 = vpop.f32.mrf.mxu0 }
 0x55c   :  { %v2326_v45 = vpop.f32.mrf.mxu0 }
 0x55e   :  { %v428_v46 = vpop.f32.mrf.mxu0 }
 0x55f   :  { %v2498_v48 = vpack.i.bf16 %v428_v46, %v425_v44 }
 0x560   :  { %v2327_v49 = vpop.f32.mrf.mxu0 }
 0x561   :  { %2499 = vrot.lane.b32.xlu1 %v2498_v48, %s3281_s24 }
 0x562   :  { %v546_v50 = vpop.f32.mrf.mxu0 }
 0x564   :  { %v2338_v51 = vpop.f32.mrf.mxu0 }
 0x565   :  { %v2151_v51 = vld [vmem:[%s3259_s9] ss:$0 sm:$0xff] }
 0x566   :  { %v549_v54 = vpop.f32.mrf.mxu0 }
 0x567   :  { %v2503_v55 = vpack.i.bf16 %v549_v54, %v546_v50 }
 0x568   :  { %v2339_v56 = vpop.f32.mrf.mxu0 }
 0x569   :  { %2504 = vrot.lane.b32.xlu0 %v2503_v55, %s3280_s2 }
 0x56a   :  { %v667_v58 = vpop.f32.mrf.mxu0 }
 0x56c   :  { %v2350_v59 = vpop.f32.mrf.mxu0 }
 0x56d   :  { %v2535_v59 = vld [vmem:[%s3262_s12 + $0x10] sm:$0xff]  }
 0x56e   :  { %v670_v60 = vpop.f32.mrf.mxu0 }
 0x56f   :  { %v2508_v61 = vpack.i.bf16 %v670_v60, %v667_v58  ;;  %v2534_v58 = vld [vmem:[%s3262_s12 + $0x18] sm:$0xff]   ;;  %v2536_v60 = vld [vmem:[%s3262_s12 + $0x8] sm:$0xff]  }
 0x570   :  { %v2351_v62 = vpop.f32.mrf.mxu0 }
 0x571   :  { %2509 = vrot.lane.b32.xlu1 %v2508_v61, %s3279_s25  ;;  %v2537_v61 = vld [vmem:[%s3262_s12] sm:$0xff]   ;;  %s3303_s25 = smov 8  }
 0x572   :  { %v2152_v62 = vld [vmem:[%s3261_s11] ss:$0 sm:$0xff] }
 0x5d3   :  { %v2500_v63 = vpop.permute.xlu1 %2499 }
 0x5d4   :  { %v2502_v1 = vunpack.i.h.bf16 %v2500_v63  ;;  %v2501_v2 = vunpack.i.l.bf16 %v2500_v63 }
 0x5d6   :  { %v699_v6 = vsel %vm192_vm2, %v307_v42, %v2502_v1  ;;  %v698_v7 = vsel %vm192_vm2, %v304_v39, %v2501_v2 }
 0x5db   :  { %v2505_v0 = vpop.permute.xlu0 %2504 }
 0x5dc   :  { %v2507_v3 = vunpack.i.h.bf16 %v2505_v0  ;;  %v2506_v4 = vunpack.i.l.bf16 %v2505_v0 }
 0x5de   :  { %v701_v10 = vsel %vm240_vm3, %v699_v6, %v2507_v3  ;;  %v700_v11 = vsel %vm240_vm3, %v698_v7, %v2506_v4 }
 0x5e3   :  { %v2510_v5 = vpop.permute.xlu1 %2509 }
 0x5e4   :  { %v2512_v8 = vunpack.i.h.bf16 %v2510_v5  ;;  %v2511_v9 = vunpack.i.l.bf16 %v2510_v5 }
 0x5e6   :  { %v704_v12 = vsel %vm702_vm4, %v701_v10, %v2512_v8  ;;  %v703_v13 = vsel %vm702_vm4, %v700_v11, %v2511_v9 }
 0x5e7   :  { %v709_v14 = vpack.c.bf16 %v704_v12, %v703_v13 }
 0x5e9   :  { %2357 = vmatmul.mubr.msk.bf16.vlgmr.msra.gmra.mxu1 %vm74_vm0, %v709_v14 }
 0x5ea   :  { %2376 = vmatprep.mubr.msk.bf16.mxu1 %vm2691_vm1, %v2690_v15  ;;  %2369 = vmatpush3.bf16.msra.mxu1 %v2534_v58  ;;  %v2162_v58 = vld [vmem:[%s3264_s14] ss:$0 sm:$0xff] }
 0x5eb   :  { %2370 = vmatprep.subr.bf16.mxu1 %v2690_v15 }
 0x5ee   :  { %2371 = vmatpush3.bf16.msra.mxu1 %v2535_v59 }
 0x5ef   :  { %2372 = vmatprep.subr.bf16.mxu1 %v2690_v15 }
 0x5f2   :  { %2373 = vmatpush3.bf16.msra.mxu1 %v2536_v60 }
 0x5f3   :  { %2374 = vmatprep.subr.bf16.mxu1 %v2690_v15 }
 0x5f6   :  { %2375 = vmatpush3.bf16.msra.mxu1 %v2537_v61 }
 0x5f7   :  { %2394 = vmatprep.subr.bf16.mxu1 %v2690_v15 }
 0x6a9   :  { %v766_v17 = vpop.f32.mrf.mxu1 }
 0x6aa   :  { %v767_v41 = vadd.f32 %v2146_v16, %v766_v17 }
 0x6ab   :  { %v2358_v18 = vpop.f32.mrf.mxu1 }
 0x6ac   :  { %v773_v19 = vadd.f32 %v767_v41, %v2848_v31 }
 0x6ad   :  { %v769_v20 = vpop.f32.mrf.mxu1 }
 0x6ae   :  { %v770_v21 = vadd.f32 %v2146_v16, %v769_v20  ;;  %v777_v22 = vsel %vm74_vm0, %v773_v19, 0.0 }
 0x6af   :  { %778 = vadd.xlane.f32.xlu0 %v777_v22  ;;  %v2359_v23 = vpop.f32.mrf.mxu1 }
 0x6b0   :  { %v774_v24 = vadd.f32 %v770_v21, %v2850_v32  ;;  %v2532_v32 = vld [vmem:[%s3260_s10 + $0x8] sm:$0xff]  }
 0x6b1   :  { %2361 = vmatpush3.bf16.msra.mxu0 %v2532_v32 }
 0x6b2   :  { %v780_v25 = vsel %vm74_vm0, %v774_v24, 0.0  ;;  %2362 = vmatprep.subr.bf16.mxu0 %v2690_v15 }
 0x6b3   :  { %781 = vadd.xlane.f32.xlu1 %v780_v25 }
 0x6b5   :  { %2363 = vmatpush3.bf16.msra.mxu0 %v2533_v37 }
 0x6b6   :  { %2380 = vmatprep.subr.bf16.mxu0 %v2690_v15 }
 0x738   :  { %v779_v26 = vpop.xlane.xlu0 %778 }
 0x739   :  { %v783_v27 = vmul.f32 0.03125, %v779_v26 }
 0x73b   :  { %v785_v28 = vsub.f32 %v773_v19, %v783_v27 }
 0x73c   :  { %v782_v29 = vpop.xlane.xlu1 %781 }
 0x73d   :  { %v784_v30 = vmul.f32 0.03125, %v782_v29  ;;  %v787_v33 = vmul.f32 %v785_v28, %v785_v28 }
 0x73f   :  { %v786_v34 = vsub.f32 %v774_v24, %v784_v30  ;;  %v789_v31 = vsel %vm74_vm0, %v787_v33, 0.0  ;;  %v2156_v24 = vld [vmem:[%s3263_s13] ss:$0 sm:$0xff] }
 0x740   :  { %790 = vadd.xlane.f32.xlu0 %v789_v31 }
 0x741   :  { %v788_v35 = vmul.f32 %v786_v34, %v786_v34 }
 0x743   :  { %v792_v36 = vsel %vm74_vm0, %v788_v35, 0.0 }
 0x744   :  { %793 = vadd.xlane.f32.xlu0 %v792_v36 }
 0x7c9   :  { %v791_v38 = vpop.xlane.xlu0 %790 }
 0x7ca   :  { %v795_v39 = vmul.f32 0.03125, %v791_v38 }
 0x7cc   :  { %v797_v40 = vadd.f32 1e-12, %v795_v39 }
 0x7cd   :  { %v794_v42 = vpop.xlane.xlu0 %793 }
 0x7ce   :  { %2588 = vrsqrt.f32 %v797_v40  ;;  %v796_v43 = vmul.f32 0.03125, %v794_v42 }
 0x7d0   :  { %v798_v44 = vadd.f32 1e-12, %v796_v43 }
 0x7d2   :  { %2590 = vrsqrt.f32 %v798_v44 }
 0x7db   :  { %v2589_v45 = vpop.eup %2588 }
 0x7dc   :  { %v801_v46 = vmul.f32 %v2589_v45, %v785_v28 }
 0x7de   :  { %v809_v50 = vmul.f32 %v2150_v47, %v801_v46  ;;  %v2538_v46 = vld [vmem:[%s3292_s0 + $0x18] sm:$0xff]  }
 0x7df   :  { %v2591_v48 = vpop.eup %2590 }
 0x7e0   :  { %v802_v49 = vmul.f32 %v2591_v48, %v786_v34  ;;  %v817_v54 = vadd.f32 %v2151_v51, %v809_v50 }
 0x7e2   :  { %v810_v52 = vmul.f32 %v2150_v47, %v802_v49  ;;  %v2539_v47 = vld [vmem:[%s3292_s0 + $0x10] sm:$0xff]   ;;  %s3304_s0 = smov 16  }
 0x7e4   :  { %v818_v55 = vadd.f32 %v2151_v51, %v810_v52 }
 0x7e6   :  { %v823_v56 = vpack.c.bf16 %v818_v55, %v817_v54 }
 0x7e8   :  { %2365 = vmatmul.mubr.msk.bf16.vlgmr.msra.gmra.mxu0 %vm74_vm0, %v823_v56 }
 0x7e9   :  { %2384 = vmatprep.mubr.msk.bf16.mxu0 %vm2691_vm1, %v2690_v15  ;;  %2381 = vmatpush3.bf16.msra.mxu0 %v2538_v46 }
 0x7ea   :  { %2382 = vmatprep.subr.bf16.mxu0 %v2690_v15 }
 0x7ed   :  { %2383 = vmatpush3.bf16.msra.mxu0 %v2539_v47 }
 0x7ee   :  { %2388 = vmatprep.subr.bf16.mxu0 %v2690_v15 }
 0x8a8   :  { %v880_v63 = vpop.f32.mrf.mxu0 }
 0x8a9   :  { %v881_v0 = vadd.f32 %v2152_v62, %v880_v63 }
 0x8aa   :  { %v2366_v1 = vpop.f32.mrf.mxu0 }
 0x8ab   :  { %v889_v2 = vmul.f32 0.044715, %v881_v0  ;;  %v887_v18 = vmul.f32 0.5, %v881_v0 }
 0x8ac   :  { %v883_v3 = vpop.f32.mrf.mxu0 }
 0x8ad   :  { %v891_v4 = vmul.f32 %v889_v2, %v881_v0  ;;  %v884_v5 = vadd.f32 %v2152_v62, %v883_v3  ;;  %v2163_v62 = vld [vmem:[%s3265_s15] ss:$0 sm:$0xff] }
 0x8ae   :  { %v2367_v6 = vpop.f32.mrf.mxu0 }
 0x8af   :  { %v893_v7 = vmul.f32 %v891_v4, %v881_v0  ;;  %v890_v8 = vmul.f32 0.044715, %v884_v5  ;;  %v888_v19 = vmul.f32 0.5, %v884_v5  ;;  %v2169_v4 = vld [vmem:[%s3295_s27 + $0x1] ss:$0 sm:$0xff]  ;;  %s3297_s27 = smov 104  }
 0x8b1   :  { %v895_v9 = vadd.f32 %v893_v7, %v881_v0  ;;  %v892_v10 = vmul.f32 %v890_v8, %v884_v5 }
 0x8b3   :  { %v897_v11 = vmul.f32 0.7978846, %v895_v9  ;;  %v894_v12 = vmul.f32 %v892_v10, %v884_v5 }
 0x8b5   :  { %2592 = vtanh.f32 %v897_v11  ;;  %v896_v13 = vadd.f32 %v894_v12, %v884_v5 }
 0x8b7   :  { %v898_v14 = vmul.f32 0.7978846, %v896_v13 }
 0x8b9   :  { %2594 = vtanh.f32 %v898_v14 }
 0x8c2   :  { %v2593_v16 = vpop.eup %2592 }
 0x8c3   :  { %v901_v17 = vadd.f32 1.0, %v2593_v16 }
 0x8c5   :  { %v903_v21 = vmul.f32 %v901_v17, %v887_v18 }
 0x8c6   :  { %v2595_v41 = vpop.eup %2594 }
 0x8c7   :  { %v902_v20 = vadd.f32 1.0, %v2595_v41 }
 0x8c9   :  { %v904_v22 = vmul.f32 %v902_v20, %v888_v19 }
 0x8cb   :  { %v913_v23 = vpack.c.bf16 %v904_v22, %v903_v21 }
 0x8cd   :  { %2377 = vmatmul.mubr.msk.bf16.vlgmr.msra.gmra.mxu1 %vm945_vm5, %v913_v23 }
 0x8ce   :  { %2396 = vmatprep.mubr.msk.bf16.mxu1 %vm2691_vm1, %v2690_v15 }
 0x98d   :  { %v983_v25 = vpop.f32.mrf.mxu1 }
 0x98e   :  { %v984_v26 = vadd.f32 %v2156_v24, %v983_v25 }
 0x98f   :  { %v2378_v27 = vpop.f32.mrf.mxu1 }
 0x990   :  { %v990_v28 = vadd.f32 %v984_v26, %v817_v54 }
 0x991   :  { %v986_v29 = vpop.f32.mrf.mxu1 }
 0x992   :  { %v987_v30 = vadd.f32 %v2156_v24, %v986_v29  ;;  %v994_v33 = vsel %vm74_vm0, %v990_v28, 0.0 }
 0x993   :  { %995 = vadd.xlane.f32.xlu0 %v994_v33  ;;  %v2379_v34 = vpop.f32.mrf.mxu1 }
 0x994   :  { %v991_v31 = vadd.f32 %v987_v30, %v818_v55 }
 0x996   :  { %v997_v35 = vsel %vm74_vm0, %v991_v31, 0.0 }
 0x997   :  { %998 = vadd.xlane.f32.xlu1 %v997_v35 }
 0xa1c   :  { %v996_v36 = vpop.xlane.xlu0 %995 }
 0xa1d   :  { %v1000_v32 = vmul.f32 0.03125, %v996_v36 }
 0xa1f   :  { %v1002_v37 = vsub.f32 %v990_v28, %v1000_v32 }
 0xa20   :  { %v999_v38 = vpop.xlane.xlu1 %998 }
 0xa21   :  { %v1001_v39 = vmul.f32 0.03125, %v999_v38  ;;  %v1004_v40 = vmul.f32 %v1002_v37, %v1002_v37 }
 0xa23   :  { %v1003_v42 = vsub.f32 %v991_v31, %v1001_v39  ;;  %v1006_v43 = vsel %vm74_vm0, %v1004_v40, 0.0 }
 0xa24   :  { %1007 = vadd.xlane.f32.xlu0 %v1006_v43 }
 0xa25   :  { %v1005_v44 = vmul.f32 %v1003_v42, %v1003_v42 }
 0xa27   :  { %v1009_v45 = vsel %vm74_vm0, %v1005_v44, 0.0 }
 0xa28   :  { %1010 = vadd.xlane.f32.xlu1 %v1009_v45 }
 0xaad   :  { %v1008_v48 = vpop.xlane.xlu0 %1007 }
 0xaae   :  { %v1012_v49 = vmul.f32 0.03125, %v1008_v48 }
 0xab0   :  { %v1014_v50 = vadd.f32 1e-12, %v1012_v49 }
 0xab1   :  { %v1011_v51 = vpop.xlane.xlu1 %1010 }
 0xab2   :  { %2596 = vrsqrt.f32 %v1014_v50  ;;  %v1013_v52 = vmul.f32 0.03125, %v1011_v51 }
 0xab4   :  { %v1015_v54 = vadd.f32 1e-12, %v1013_v52 }
 0xab6   :  { %2598 = vrsqrt.f32 %v1015_v54 }
 0xabf   :  { %v2597_v55 = vpop.eup %2596 }
 0xac0   :  { %v1018_v56 = vmul.f32 %v2597_v55, %v1002_v37 }
 0xac2   :  { %v1026_v61 = vmul.f32 %v2162_v58, %v1018_v56 }
 0xac3   :  { %v2599_v59 = vpop.eup %2598 }
 0xac4   :  { %v1019_v60 = vmul.f32 %v2599_v59, %v1003_v42  ;;  %v3044_v0 = vadd.f32 %v2163_v62, %v1026_v61 }
 0xac6   :  { %v1027_v63 = vmul.f32 %v2162_v58, %v1019_v60 }
 0xac8   :  { %v3046_v1 = vadd.f32 %v2163_v62, %v1027_v63 }
 0xaca   :  { %v1041_v2 = vpack.c.bf16 %v3046_v1, %v3044_v0 }
 0xacc   :  { %2385 = vmatmul.mubr.msk.bf16.vlgmr.msra.gmra.mxu0 %vm74_vm0, %v1041_v2 }
 0xacd   :  { %2390 = vmatprep.mubr.msk.bf16.mxu0 %vm2691_vm1, %v2690_v15 }
 0xb8c   :  { %v1099_v3 = vpop.f32.mrf.mxu0 }
 0xb8d   :  { %v1100_v7 = vadd.f32 %v2169_v4, %v1099_v3 }
 0xb8e   :  { %v2386_v5 = vpop.f32.mrf.mxu0 }
 0xb90   :  { %v1102_v6 = vpop.f32.mrf.mxu0 }
 0xb91   :  { %v1103_v8 = vadd.f32 %v2169_v4, %v1102_v6 }
 0xb92   :  { %v2387_v9 = vpop.f32.mrf.mxu0 }
 0xb93   :  { %v3056_v10 = vpack.c.bf16 %v1103_v8, %v1100_v7 }
 0xb95   :  { %1229 = vrot.lane.b32.xlu1 %v3056_v10, %s2692_s3  ;;  %1108 = vrot.lane.b32.xlu0 %v3056_v10, %s2693_s28  ;;  %s3299_s3 = smov 64   ;;  %s3300_s28 = smov 48  }
 0xb99   :  { %1227 = vrot.lane.b32.xlu1 %v3056_v10, %s2694_s29  ;;  %1348 = vrot.lane.b32.xlu0 %v3056_v10, %s2695_s4  ;;  %s3301_s29 = smov 40   ;;  %s3302_s4 = smov 56  }
 0xb9d   :  { %1350 = vrot.lane.b32.xlu1 %v3056_v10, %s2696_s30  ;;  %1469 = vrot.lane.b32.xlu0 %v3056_v10, %s3297_s27 }
 0xba1   :  { %1471 = vrot.lane.b32.xlu1 %v3056_v10, %s3298_s1 }
 0xc07   :  { %v1109_v11 = vpop.permute.xlu0 %1108  ;;  %v1230_v13 = vpop.permute.xlu1 %1229 }
 0xc08   :  { %v1114_v12 = vsel %vm192_vm2, %v1109_v11, 0  ;;  %v1235_v16 = vsel %vm192_vm2, %v1230_v13, 0 }
 0xc09   :  { %2389 = vmatpush3.bf16.xpose.msra.mxu0 %v1114_v12 }
 0xc0a   :  { %2400 = vmatprep.subr.bf16.mxu0 %v2690_v15 }
 0xc0b   :  { %v1228_v14 = vpop.permute.xlu1 %1227  ;;  %v1349_v19 = vpop.permute.xlu0 %1348 }
 0xc0f   :  { %v1351_v17 = vpop.permute.xlu1 %1350  ;;  %v1470_v21 = vpop.permute.xlu0 %1469 }
 0xc10   :  { %2391 = vmatmul.mubr.msk.bf16.vlgmr.msra.gmra.mxu0 %vm192_vm2, %v3056_v10  ;;  %v1356_v41 = vsel %vm192_vm2, %v1351_v17, 0 }
 0xc11   :  { %2401 = vmatpush3.bf16.xpose.msra.mxu0 %v1235_v16  ;;  %2402 = vmatprep.mubr.msk.bf16.mxu0 %vm2691_vm1, %v2690_v15 }
 0xc12   :  { %2412 = vmatprep.subr.bf16.mxu0 %v2690_v15 }
 0xc13   :  { %v1472_v18 = vpop.permute.xlu1 %1471 }
 0xc14   :  { %v1477_v20 = vsel %vm192_vm2, %v1472_v18, 0 }
 0xc18   :  { %2403 = vmatmul.mubr.msk.bf16.vlgmr.msra.gmra.mxu0 %vm192_vm2, %v1228_v14 }
 0xc19   :  { %2413 = vmatpush3.bf16.xpose.msra.mxu0 %v1356_v41  ;;  %2414 = vmatprep.mubr.msk.bf16.mxu0 %vm2691_vm1, %v2690_v15 }
 0xc1a   :  { %2424 = vmatprep.subr.bf16.mxu0 %v2690_v15 }
 0xc20   :  { %2415 = vmatmul.mubr.msk.bf16.vlgmr.msra.gmra.mxu0 %vm192_vm2, %v1349_v19 }
 0xc21   :  { %2425 = vmatpush3.bf16.xpose.msra.mxu0 %v1477_v20  ;;  %2426 = vmatprep.mubr.msk.bf16.mxu0 %vm2691_vm1, %v2690_v15 }
 0xc22   :  { %2436 = vmatprep.subr.bf16.mxu0 %v2690_v15 }
 0xc28   :  { %2427 = vmatmul.mubr.msk.bf16.vlgmr.msra.gmra.mxu0 %vm192_vm2, %v1470_v21 }
 0xc29   :  { %2440 = vmatprep.mubr.msk.bf16.mxu0 %vm2691_vm1, %v2690_v15 }
 0xcd0   :  { %v1150_v22 = vpop.f32.mrf.mxu0 }
 0xcd1   :  { %v1151_v23 = vadd.f32 %v1150_v22, %v2900_v53 }
 0xcd2   :  { %v2392_v24 = vpop.f32.mrf.mxu0 }
 0xcd3   :  { %v1157_v25 = vsel %vm240_vm3, %v1151_v23, -inf }
 0xcd4   :  { %1158 = vmax.xlane.f32.xlu1 %v1157_v25  ;;  %v1153_v26 = vpop.f32.mrf.mxu0 }
 0xcd5   :  { %v1154_v27 = vadd.f32 %v1153_v26, %v2906_v57 }
 0xcd6   :  { %v2393_v28 = vpop.f32.mrf.mxu0 }
 0xcd7   :  { %v1160_v29 = vsel %vm240_vm3, %v1154_v27, -inf }
 0xcd8   :  { %1161 = vmax.xlane.f32.xlu0 %v1160_v29  ;;  %v1271_v30 = vpop.f32.mrf.mxu0 }
 0xcd9   :  { %v1272_v33 = vadd.f32 %v1271_v30, %v2900_v53 }
 0xcda   :  { %v2404_v34 = vpop.f32.mrf.mxu0 }
 0xcdb   :  { %v1278_v31 = vsel %vm240_vm3, %v1272_v33, -inf }
 0xcdc   :  { %1279 = vmax.xlane.f32.xlu0 %v1278_v31  ;;  %v1274_v35 = vpop.f32.mrf.mxu0 }
 0xcdd   :  { %v1275_v36 = vadd.f32 %v1274_v35, %v2906_v57 }
 0xcde   :  { %v2405_v32 = vpop.f32.mrf.mxu0 }
 0xcdf   :  { %v1281_v37 = vsel %vm240_vm3, %v1275_v36, -inf }
 0xce0   :  { %1282 = vmax.xlane.f32.xlu0 %v1281_v37  ;;  %v1392_v38 = vpop.f32.mrf.mxu0 }
 0xce1   :  { %v1393_v39 = vadd.f32 %v1392_v38, %v2900_v53 }
 0xce2   :  { %v2416_v40 = vpop.f32.mrf.mxu0 }
 0xce3   :  { %v1399_v42 = vsel %vm240_vm3, %v1393_v39, -inf }
 0xce4   :  { %1400 = vmax.xlane.f32.xlu1 %v1399_v42  ;;  %v1395_v43 = vpop.f32.mrf.mxu0 }
 0xce5   :  { %v1396_v44 = vadd.f32 %v1395_v43, %v2906_v57 }
 0xce6   :  { %v2417_v45 = vpop.f32.mrf.mxu0 }
 0xce7   :  { %v1402_v46 = vsel %vm240_vm3, %v1396_v44, -inf }
 0xce8   :  { %1403 = vmax.xlane.f32.xlu0 %v1402_v46  ;;  %v1513_v47 = vpop.f32.mrf.mxu0 }
 0xce9   :  { %v1514_v48 = vadd.f32 %v1513_v47, %v2900_v53 }
 0xcea   :  { %v2428_v49 = vpop.f32.mrf.mxu0 }
 0xceb   :  { %v1520_v50 = vsel %vm240_vm3, %v1514_v48, -inf }
 0xcec   :  { %1521 = vmax.xlane.f32.xlu1 %v1520_v50  ;;  %v1516_v51 = vpop.f32.mrf.mxu0 }
 0xced   :  { %v1517_v52 = vadd.f32 %v1516_v51, %v2906_v57 }
 0xcee   :  { %v2429_v54 = vpop.f32.mrf.mxu0 }
 0xcef   :  { %v1523_v55 = vsel %vm240_vm3, %v1517_v52, -inf }
 0xcf0   :  { %1524 = vmax.xlane.f32.xlu0 %v1523_v55 }
 0xcfd   :  { %1180 = vrot.lane.b32.xlu1 %v3056_v10, %s3299_s3 }
 0xd5d   :  { %v1159_v56 = vpop.xlane.xlu1 %1158 }
 0xd5e   :  { %v1163_v58 = vsub.f32 %v1151_v23, %v1159_v56 }
 0xd60   :  { %v1165_v59 = vmul.f32 1.442695, %v1163_v58 }
 0xd61   :  { %v1162_v60 = vpop.xlane.xlu0 %1161 }
 0xd62   :  { %2600 = vpow2.f32 %v1165_v59  ;;  %v1164_v53 = vsub.f32 %v1154_v27, %v1162_v60 }
 0xd64   :  { %v1167_v61 = vmul.f32 1.442695, %v1164_v53 }
 0xd65   :  { %v1280_v62 = vpop.xlane.xlu0 %1279 }
 0xd66   :  { %2602 = vpow2.f32 %v1167_v61  ;;  %v1284_v63 = vsub.f32 %v1272_v33, %v1280_v62 }
 0xd68   :  { %v1286_v2 = vmul.f32 1.442695, %v1284_v63 }
 0xd69   :  { %v1283_v3 = vpop.xlane.xlu0 %1282 }
 0xd6a   :  { %2604 = vpow2.f32 %v1286_v2  ;;  %v1285_v57 = vsub.f32 %v1275_v36, %v1283_v3 }
 0xd6c   :  { %v1288_v4 = vmul.f32 1.442695, %v1285_v57 }
 0xd6d   :  { %v1401_v5 = vpop.xlane.xlu1 %1400 }
 0xd6e   :  { %2606 = vpow2.f32 %v1288_v4  ;;  %v1405_v6 = vsub.f32 %v1393_v39, %v1401_v5 }
 0xd6f   :  { %v2601_v7 = vpop.eup %2600 }
 0xd70   :  { %v1407_v8 = vmul.f32 1.442695, %v1405_v6  ;;  %v1169_v9 = vsel %vm240_vm3, %v2601_v7, 0.0 }
 0xd71   :  { %v1404_v11 = vpop.xlane.xlu0 %1403  ;;  %1170 = vadd.xlane.f32.xlu1 %v1169_v9 }
 0xd72   :  { %2608 = vpow2.f32 %v1407_v8  ;;  %v1406_v12 = vsub.f32 %v1396_v44, %v1404_v11 }
 0xd73   :  { %v2603_v13 = vpop.eup %2602 }
 0xd74   :  { %v1409_v14 = vmul.f32 1.442695, %v1406_v12  ;;  %v1172_v16 = vsel %vm240_vm3, %v2603_v13, 0.0  ;;  %v2540_v12 = vld [vmem:[%s3256_s6 + $0x18] sm:$0xff]  }
 0xd75   :  { %v1522_v17 = vpop.xlane.xlu1 %1521  ;;  %1173 = vadd.xlane.f32.xlu0 %v1172_v16  ;;  %2437 = vmatpush3.bf16.msra.mxu0 %v2540_v12 }
 0xd76   :  { %2610 = vpow2.f32 %v1409_v14  ;;  %v1526_v41 = vsub.f32 %v1514_v48, %v1522_v17  ;;  %2438 = vmatprep.subr.bf16.mxu0 %v2690_v15 }
 0xd77   :  { %v2605_v18 = vpop.eup %2604 }
 0xd78   :  { %v1528_v19 = vmul.f32 1.442695, %v1526_v41  ;;  %v1290_v20 = vsel %vm240_vm3, %v2605_v18, 0.0  ;;  %v2541_v41 = vld [vmem:[%s3256_s6 + $0x10] sm:$0xff]  }
 0xd79   :  { %1291 = vadd.xlane.f32.xlu1 %v1290_v20  ;;  %v1181_v21 = vpop.permute.xlu1 %1180  ;;  %v1525_v22 = vpop.xlane.xlu0 %1524  ;;  %2439 = vmatpush3.bf16.msra.mxu0 %v2541_v41 }
 0xd7a   :  { %2612 = vpow2.f32 %v1528_v19  ;;  %v1527_v23 = vsub.f32 %v1517_v52, %v1525_v22  ;;  %2395 = vmatpush3.bf16.msra.mxu1 %v1181_v21  ;;  %2452 = vmatprep.subr.bf16.mxu0 %v2690_v15 }
 0xd7b   :  { %v2607_v24 = vpop.eup %2606  ;;  %2406 = vmatprep.subr.bf16.mxu1 %v2690_v15 }
 0xd7c   :  { %v1530_v25 = vmul.f32 1.442695, %v1527_v23  ;;  %v1293_v26 = vsel %vm240_vm3, %v2607_v24, 0.0 }
 0xd7d   :  { %1294 = vadd.xlane.f32.xlu0 %v1293_v26 }
 0xd7e   :  { %2614 = vpow2.f32 %v1530_v25 }
 0xd7f   :  { %v2609_v27 = vpop.eup %2608 }
 0xd80   :  { %v1411_v28 = vsel %vm240_vm3, %v2609_v27, 0.0 }
 0xd81   :  { %1412 = vadd.xlane.f32.xlu1 %v1411_v28 }
 0xd83   :  { %v2611_v29 = vpop.eup %2610 }
 0xd84   :  { %v1414_v30 = vsel %vm240_vm3, %v2611_v29, 0.0 }
 0xd85   :  { %1415 = vadd.xlane.f32.xlu0 %v1414_v30 }
 0xd87   :  { %v2613_v33 = vpop.eup %2612 }
 0xd88   :  { %v1532_v34 = vsel %vm240_vm3, %v2613_v33, 0.0 }
 0xd89   :  { %1533 = vadd.xlane.f32.xlu1 %v1532_v34 }
 0xd8b   :  { %v2615_v31 = vpop.eup %2614 }
 0xd8c   :  { %v1535_v35 = vsel %vm240_vm3, %v2615_v31, 0.0 }
 0xd8d   :  { %1536 = vadd.xlane.f32.xlu0 %v1535_v35 }
 0xd9a   :  { %1422 = vrot.lane.b32.xlu1 %v3056_v10, %s3300_s28 }
 0xd9e   :  { %1543 = vrot.lane.b32.xlu1 %v3056_v10, %s3301_s29 }
 0xda3   :  { %1301 = vrot.lane.b32.xlu0 %v3056_v10, %s3302_s4 }
 0xdfa   :  { %v1171_v36 = vpop.xlane.xlu1 %1170 }
 0xdfb   :  { %2616 = vrcp.f32 %v1171_v36 }
 0xdfe   :  { %v1174_v32 = vpop.xlane.xlu0 %1173 }
 0xdff   :  { %2618 = vrcp.f32 %v1174_v32 }
 0xe02   :  { %v1292_v38 = vpop.xlane.xlu1 %1291 }
 0xe06   :  { %v1295_v37 = vpop.xlane.xlu0 %1294 }
 0xe07   :  { %2620 = vrcp.f32 %v1295_v37 }
 0xe08   :  { %v2617_v39 = vpop.eup %2616  ;;  %2622 = vrcp.f32 %v1292_v38 }
 0xe09   :  { %v1177_v42 = vmul.f32 %v2617_v39, %v2601_v7 }
 0xe0a   :  { %v1413_v45 = vpop.xlane.xlu1 %1412 }
 0xe0c   :  { %v2619_v40 = vpop.eup %2618 }
 0xe0d   :  { %v1178_v43 = vmul.f32 %v2619_v40, %v2603_v13 }
 0xe0e   :  { %v1416_v44 = vpop.xlane.xlu0 %1415 }
 0xe0f   :  { %v1179_v46 = vpack.c.bf16 %v1178_v43, %v1177_v42  ;;  %2624 = vrcp.f32 %v1416_v44  ;;  %v2186_v43 = vld [vmem:[%s3257_s7 + $0x1] ss:$0 sm:$0xff] }
 0xe10   :  { %2626 = vrcp.f32 %v1413_v45 }
 0xe11   :  { %2397 = vmatmul.mubr.msk.bf16.vlgmr.msra.gmra.mxu1 %vm240_vm3, %v1179_v46 }
 0xe12   :  { %2408 = vmatprep.mubr.msk.bf16.mxu1 %vm2691_vm1, %v2690_v15  ;;  %v1534_v49 = vpop.xlane.xlu1 %1533 }
 0xe14   :  { %v2621_v10 = vpop.eup %2620 }
 0xe15   :  { %v2623_v48 = vpop.eup %2622  ;;  %v1299_v50 = vmul.f32 %v2621_v10, %v2607_v24 }
 0xe16   :  { %v1537_v47 = vpop.xlane.xlu0 %1536  ;;  %v1298_v52 = vmul.f32 %v2623_v48, %v2605_v18  ;;  %v1423_v56 = vpop.permute.xlu1 %1422 }
 0xe17   :  { %2628 = vrcp.f32 %v1537_v47 }
 0xe18   :  { %2630 = vrcp.f32 %v1534_v49  ;;  %v1300_v54 = vpack.c.bf16 %v1299_v50, %v1298_v52 }
 0xe1a   :  { %v1302_v51 = vpop.permute.xlu0 %1301  ;;  %v1544_v62 = vpop.permute.xlu1 %1543 }
 0xe1b   :  { %2407 = vmatpush3.bf16.msra.mxu1 %v1302_v51 }
 0xe1c   :  { %2418 = vmatprep.subr.bf16.mxu1 %v2690_v15  ;;  %v2625_v55 = vpop.eup %2624 }
 0xe1d   :  { %v2627_v58 = vpop.eup %2626  ;;  %v1420_v59 = vmul.f32 %v2625_v55, %v2611_v29 }
 0xe1e   :  { %2409 = vmatmul.mubr.msk.bf16.vlgmr.msra.gmra.mxu1 %vm240_vm3, %v1300_v54  ;;  %v1419_v60 = vmul.f32 %v2627_v58, %v2609_v27 }
 0xe1f   :  { %2419 = vmatpush3.bf16.msra.mxu1 %v1423_v56  ;;  %2420 = vmatprep.mubr.msk.bf16.mxu1 %vm2691_vm1, %v2690_v15 }
 0xe20   :  { %2430 = vmatprep.subr.bf16.mxu1 %v2690_v15  ;;  %v1421_v53 = vpack.c.bf16 %v1420_v59, %v1419_v60 }
 0xe24   :  { %v2629_v61 = vpop.eup %2628 }
 0xe25   :  { %v2631_v63 = vpop.eup %2630  ;;  %v1541_v2 = vmul.f32 %v2629_v61, %v2615_v31 }
 0xe26   :  { %2421 = vmatmul.mubr.msk.bf16.vlgmr.msra.gmra.mxu1 %vm240_vm3, %v1421_v53  ;;  %v1540_v3 = vmul.f32 %v2631_v63, %v2613_v33  ;;  %v2543_v63 = vld [vmem:[%s3260_s10 + $0x10] sm:$0xff]  }
 0xe27   :  { %2431 = vmatpush3.bf16.msra.mxu1 %v1544_v62  ;;  %2432 = vmatprep.mubr.msk.bf16.mxu1 %vm2691_vm1, %v2690_v15 }
 0xe28   :  { %2444 = vmatprep.subr.bf16.mxu1 %v2690_v15  ;;  %v1542_v57 = vpack.c.bf16 %v1541_v2, %v1540_v3 }
 0xe2e   :  { %2433 = vmatmul.mubr.msk.bf16.vlgmr.msra.gmra.mxu1 %vm240_vm3, %v1542_v57 }
 0xe2f   :  { %2448 = vmatprep.mubr.msk.bf16.mxu1 %vm2691_vm1, %v2690_v15 }
 0xed1   :  { %v1220_v4 = vpop.f32.mrf.mxu1 }
 0xed3   :  { %v2398_v5 = vpop.f32.mrf.mxu1 }
 0xed5   :  { %v1223_v6 = vpop.f32.mrf.mxu1 }
 0xed7   :  { %v2399_v7 = vpop.f32.mrf.mxu1 }
 0xede   :  { %v1341_v8 = vpop.f32.mrf.mxu1 }
 0xee0   :  { %v2410_v9 = vpop.f32.mrf.mxu1 }
 0xee1   :  { %v2192_v9 = vld [vmem:[%s3258_s8 + $0x1] ss:$0 sm:$0xff] }
 0xee2   :  { %v1344_v11 = vpop.f32.mrf.mxu1 }
 0xee3   :  { %v2513_v13 = vpack.i.bf16 %v1344_v11, %v1341_v8 }
 0xee4   :  { %v2411_v14 = vpop.f32.mrf.mxu1 }
 0xee5   :  { %2514 = vrot.lane.b32.xlu1 %v2513_v13, %s3303_s25  ;;  %v2193_v14 = vld [vmem:[%s3259_s9 + $0x1] ss:$0 sm:$0xff] }
 0xee6   :  { %v1462_v16 = vpop.f32.mrf.mxu1 }
 0xee8   :  { %v2422_v17 = vpop.f32.mrf.mxu1 }
 0xeea   :  { %v1465_v18 = vpop.f32.mrf.mxu1 }
 0xeeb   :  { %v2518_v19 = vpack.i.bf16 %v1465_v18, %v1462_v16 }
 0xeec   :  { %v2423_v20 = vpop.f32.mrf.mxu1 }
 0xeed   :  { %2519 = vrot.lane.b32.xlu0 %v2518_v19, %s3304_s0  ;;  %v2544_v19 = vld [vmem:[%s3262_s12 + $0x38] sm:$0xff]   ;;  %v2545_v20 = vld [vmem:[%s3262_s12 + $0x30] sm:$0xff]  }
 0xeee   :  { %v1583_v21 = vpop.f32.mrf.mxu1 }
 0xef0   :  { %v2434_v22 = vpop.f32.mrf.mxu1 }
 0xef1   :  { %v2547_v22 = vld [vmem:[%s3262_s12 + $0x20] sm:$0xff]  }
 0xef2   :  { %v1586_v23 = vpop.f32.mrf.mxu1 }
 0xef3   :  { %v2523_v24 = vpack.i.bf16 %v1586_v23, %v1583_v21  ;;  %v2546_v21 = vld [vmem:[%s3262_s12 + $0x28] sm:$0xff]   ;;  %v2199_v23 = vld [vmem:[%s3261_s11 + $0x1] ss:$0 sm:$0xff] }
 0xef4   :  { %v2435_v25 = vpop.f32.mrf.mxu1 }
 0xef5   :  { %2524 = vrot.lane.b32.xlu1 %v2523_v24, %s3305_s5 }
 0xf57   :  { %v2515_v26 = vpop.permute.xlu1 %2514 }
 0xf58   :  { %v2517_v28 = vunpack.i.h.bf16 %v2515_v26  ;;  %v2516_v29 = vunpack.i.l.bf16 %v2515_v26 }
 0xf5a   :  { %v1615_v31 = vsel %vm192_vm2, %v1223_v6, %v2517_v28  ;;  %v1614_v35 = vsel %vm192_vm2, %v1220_v4, %v2516_v29 }
 0xf5f   :  { %v2520_v27 = vpop.permute.xlu0 %2519 }
 0xf60   :  { %v2522_v30 = vunpack.i.h.bf16 %v2520_v27  ;;  %v2521_v33 = vunpack.i.l.bf16 %v2520_v27 }
 0xf62   :  { %v1617_v37 = vsel %vm240_vm3, %v1615_v31, %v2522_v30  ;;  %v1616_v38 = vsel %vm240_vm3, %v1614_v35, %v2521_v33 }
 0xf67   :  { %v2525_v34 = vpop.permute.xlu1 %2524 }
 0xf68   :  { %v2527_v36 = vunpack.i.h.bf16 %v2525_v34  ;;  %v2526_v32 = vunpack.i.l.bf16 %v2525_v34 }
 0xf6a   :  { %v1619_v39 = vsel %vm702_vm4, %v1617_v37, %v2527_v36  ;;  %v1618_v40 = vsel %vm702_vm4, %v1616_v38, %v2526_v32 }
 0xf6b   :  { %v1625_v42 = vpack.c.bf16 %v1619_v39, %v1618_v40 }
 0xf6d   :  { %2441 = vmatmul.mubr.msk.bf16.vlgmr.msra.gmra.mxu0 %vm74_vm0, %v1625_v42 }
 0xf6e   :  { %2460 = vmatprep.mubr.msk.bf16.mxu0 %vm2691_vm1, %v2690_v15  ;;  %2453 = vmatpush3.bf16.msra.mxu0 %v2544_v19 }
 0xf6f   :  { %2454 = vmatprep.subr.bf16.mxu0 %v2690_v15 }
 0xf72   :  { %2455 = vmatpush3.bf16.msra.mxu0 %v2545_v20 }
 0xf73   :  { %2456 = vmatprep.subr.bf16.mxu0 %v2690_v15 }
 0xf76   :  { %2457 = vmatpush3.bf16.msra.mxu0 %v2546_v21 }
 0xf77   :  { %2458 = vmatprep.subr.bf16.mxu0 %v2690_v15 }
 0xf7a   :  { %2459 = vmatpush3.bf16.msra.mxu0 %v2547_v22  ;;  %v2221_v22 = vld [vmem:[%s3265_s15 + $0x1] ss:$0 sm:$0xff] }
0x102d   :  { %v1683_v44 = vpop.f32.mrf.mxu0 }
0x102e   :  { %v1684_v45 = vadd.f32 %v2186_v43, %v1683_v44 }
0x102f   :  { %v2442_v46 = vpop.f32.mrf.mxu0 }
0x1030   :  { %v1690_v10 = vadd.f32 %v1684_v45, %v3044_v0 }
0x1031   :  { %v1686_v47 = vpop.f32.mrf.mxu0 }
0x1032   :  { %v1687_v48 = vadd.f32 %v2186_v43, %v1686_v47  ;;  %v1696_v49 = vsel %vm74_vm0, %v1690_v10, 0.0 }
0x1033   :  { %1697 = vadd.xlane.f32.xlu0 %v1696_v49  ;;  %v2443_v50 = vpop.f32.mrf.mxu0  ;;  %v2212_v49 = vld [vmem:[%s3263_s13 + $0x1] ss:$0 sm:$0xff] }
0x1034   :  { %v1691_v51 = vadd.f32 %v1687_v48, %v3046_v1  ;;  %v2542_v1 = vld [vmem:[%s3260_s10 + $0x18] sm:$0xff]  }
0x1035   :  { %2445 = vmatpush3.bf16.msra.mxu1 %v2542_v1 }
0x1036   :  { %v1699_v52 = vsel %vm74_vm0, %v1691_v51, 0.0  ;;  %2446 = vmatprep.subr.bf16.mxu1 %v2690_v15 }
0x1037   :  { %1700 = vadd.xlane.f32.xlu1 %v1699_v52 }
0x1039   :  { %2447 = vmatpush3.bf16.msra.mxu1 %v2543_v63 }
0x103a   :  { %2464 = vmatprep.subr.bf16.mxu1 %v2690_v15 }
0x10bc   :  { %v1698_v54 = vpop.xlane.xlu0 %1697 }
0x10bd   :  { %v1702_v55 = vmul.f32 0.03125, %v1698_v54 }
0x10bf   :  { %v1704_v56 = vsub.f32 %v1690_v10, %v1702_v55 }
0x10c0   :  { %v1701_v58 = vpop.xlane.xlu1 %1700 }
0x10c1   :  { %v1703_v59 = vmul.f32 0.03125, %v1701_v58  ;;  %v1706_v60 = vmul.f32 %v1704_v56, %v1704_v56 }
0x10c3   :  { %v1705_v53 = vsub.f32 %v1691_v51, %v1703_v59  ;;  %v1708_v0 = vsel %vm74_vm0, %v1706_v60, 0.0 }
0x10c4   :  { %1709 = vadd.xlane.f32.xlu0 %v1708_v0 }
0x10c5   :  { %v1707_v61 = vmul.f32 %v1705_v53, %v1705_v53 }
0x10c7   :  { %v1711_v62 = vsel %vm74_vm0, %v1707_v61, 0.0 }
0x10c8   :  { %1712 = vadd.xlane.f32.xlu0 %v1711_v62 }
0x114d   :  { %v1710_v2 = vpop.xlane.xlu0 %1709 }
0x114e   :  { %v1714_v3 = vmul.f32 0.03125, %v1710_v2 }
0x1150   :  { %v1716_v57 = vadd.f32 1e-12, %v1714_v3 }
0x1151   :  { %v1713_v4 = vpop.xlane.xlu0 %1712 }
0x1152   :  { %2632 = vrsqrt.f32 %v1716_v57  ;;  %v1715_v5 = vmul.f32 0.03125, %v1713_v4 }
0x1154   :  { %v1717_v6 = vadd.f32 1e-12, %v1715_v5 }
0x1156   :  { %2634 = vrsqrt.f32 %v1717_v6  ;;  %v2548_v6 = vld [vmem:[%s3266_s16 + $0x8] sm:$0xff]  }
0x115f   :  { %v2633_v7 = vpop.eup %2632 }
0x1160   :  { %v1720_v8 = vmul.f32 %v2633_v7, %v1704_v56  ;;  %v2549_v7 = vld [vmem:[%s3266_s16] sm:$0xff]  }
0x1162   :  { %v1728_v13 = vmul.f32 %v2192_v9, %v1720_v8 }
0x1163   :  { %v2635_v11 = vpop.eup %2634 }
0x1164   :  { %v1721_v12 = vmul.f32 %v2635_v11, %v1705_v53  ;;  %v1736_v17 = vadd.f32 %v2193_v14, %v1728_v13 }
0x1166   :  { %v1729_v16 = vmul.f32 %v2192_v9, %v1721_v12 }
0x1168   :  { %v1737_v41 = vadd.f32 %v2193_v14, %v1729_v16 }
0x116a   :  { %v1743_v18 = vpack.c.bf16 %v1737_v41, %v1736_v17 }
0x116c   :  { %2449 = vmatmul.mubr.msk.bf16.vlgmr.msra.gmra.mxu1 %vm74_vm0, %v1743_v18  ;;  %v2220_v18 = vld [vmem:[%s3264_s14 + $0x1] ss:$0 sm:$0xff] }
0x116d   :  { %2468 = vmatprep.mubr.msk.bf16.mxu1 %vm2691_vm1, %v2690_v15  ;;  %2465 = vmatpush3.bf16.msra.mxu1 %v2548_v6 }
0x116e   :  { %2466 = vmatprep.subr.bf16.mxu1 %v2690_v15 }
0x1171   :  { %2467 = vmatpush3.bf16.msra.mxu1 %v2549_v7 }
0x1172   :  { %2472 = vmatprep.subr.bf16.mxu1 %v2690_v15 }
0x122c   :  { %v1801_v24 = vpop.f32.mrf.mxu1 }
0x122d   :  { %v1802_v25 = vadd.f32 %v2199_v23, %v1801_v24 }
0x122e   :  { %v2450_v26 = vpop.f32.mrf.mxu1 }
0x122f   :  { %v1810_v27 = vmul.f32 0.044715, %v1802_v25  ;;  %v1808_v44 = vmul.f32 0.5, %v1802_v25 }
0x1230   :  { %v1804_v28 = vpop.f32.mrf.mxu1 }
0x1231   :  { %v1812_v29 = vmul.f32 %v1810_v27, %v1802_v25  ;;  %v1805_v30 = vadd.f32 %v2199_v23, %v1804_v28  ;;  %v2550_v28 = vld [vmem:[%s3268_s18 + $0x8] sm:$0xff]  }
0x1232   :  { %v2451_v33 = vpop.f32.mrf.mxu1 }
0x1233   :  { %v1814_v34 = vmul.f32 %v1812_v29, %v1802_v25  ;;  %v1811_v31 = vmul.f32 0.044715, %v1805_v30  ;;  %v1809_v45 = vmul.f32 0.5, %v1805_v30  ;;  %v2551_v29 = vld [vmem:[%s3268_s18] sm:$0xff]   ;;  %s2706_s18 = smov [#allocation4]  }
0x1234   :  { %s2120_s4 = sshll.u32 %s2706_s18, 4  ;;  %s2121_s4 = int_to_ptr.vmem [resolvable:$true] %s2120_s4 }
0x1235   :  { %v1816_v35 = vadd.f32 %v1814_v34, %v1802_v25  ;;  %v1813_v36 = vmul.f32 %v1811_v31, %v1805_v30  ;;  %s2646_s30 = scalar_lea.vmem %s2121_s4, 32  ;;  %p2651_p1 = scmp.lt.s32.totalorder %s2121_s4, %s2121_s4 }
0x1236   :  { %p2647_p0 = scmp.ne.s32.totalorder %s2121_s4, %s2646_s30  ;;  %p2652_p2 = scmp.lt.s32.totalorder %s2646_s30, %s2646_s30 }
0x1237   :  { %v1818_v32 = vmul.f32 0.7978846, %v1816_v35  ;;  %v1815_v37 = vmul.f32 %v1813_v36, %v1805_v30 }
0x1238   :  { %p2653_p3 = por %p2652_p2, %p2651_p1 }
0x1239   :  { %2636 = vtanh.f32 %v1818_v32  ;;  %v1817_v38 = vadd.f32 %v1815_v37, %v1805_v30  ;;  %v2222_v30 = vld [vmem:[%s3267_s17] ss:$0 sm:$0xff] }
0x123a   :  { %p2654_p4 = pnand %p2653_p3, %p2647_p0 }
0x123b   :  { %v1819_v39 = vmul.f32 0.7978846, %v1817_v38 }
0x123d   :  { %2638 = vtanh.f32 %v1819_v39 }
0x1246   :  { %v2637_v40 = vpop.eup %2636 }
0x1247   :  { %v1822_v42 = vadd.f32 1.0, %v2637_v40 }
0x1249   :  { %v1824_v10 = vmul.f32 %v1822_v42, %v1808_v44 }
0x124a   :  { %v2639_v43 = vpop.eup %2638 }
0x124b   :  { %v1823_v46 = vadd.f32 1.0, %v2639_v43 }
0x124d   :  { %v1825_v47 = vmul.f32 %v1823_v46, %v1809_v45 }
0x124f   :  { %v1835_v48 = vpack.c.bf16 %v1825_v47, %v1824_v10 }
0x1251   :  { %2461 = vmatmul.mubr.msk.bf16.vlgmr.msra.gmra.mxu0 %vm945_vm5, %v1835_v48 }
0x1311   :  { %v1905_v50 = vpop.f32.mrf.mxu0 }
0x1312   :  { %v1906_v51 = vadd.f32 %v2212_v49, %v1905_v50 }
0x1313   :  { %v2462_v52 = vpop.f32.mrf.mxu0 }
0x1314   :  { %v1912_v54 = vadd.f32 %v1906_v51, %v1736_v17 }
0x1315   :  { %v1908_v55 = vpop.f32.mrf.mxu0 }
0x1316   :  { %v1909_v56 = vadd.f32 %v2212_v49, %v1908_v55  ;;  %v1918_v58 = vsel %vm74_vm0, %v1912_v54, 0.0 }
0x1317   :  { %1919 = vadd.xlane.f32.xlu1 %v1918_v58  ;;  %v2463_v59 = vpop.f32.mrf.mxu0 }
0x1318   :  { %v1913_v60 = vadd.f32 %v1909_v56, %v1737_v41 }
0x131a   :  { %v1921_v53 = vsel %vm74_vm0, %v1913_v60, 0.0 }
0x131b   :  { %1922 = vadd.xlane.f32.xlu0 %v1921_v53 }
0x13a0   :  { %v1920_v0 = vpop.xlane.xlu1 %1919 }
0x13a1   :  { %v1924_v61 = vmul.f32 0.03125, %v1920_v0 }
0x13a3   :  { %v1926_v62 = vsub.f32 %v1912_v54, %v1924_v61 }
0x13a4   :  { %v1923_v1 = vpop.xlane.xlu0 %1922 }
0x13a5   :  { %v1925_v63 = vmul.f32 0.03125, %v1923_v1  ;;  %v1928_v2 = vmul.f32 %v1926_v62, %v1926_v62 }
0x13a7   :  { %v1927_v3 = vsub.f32 %v1913_v60, %v1925_v63  ;;  %v1930_v57 = vsel %vm74_vm0, %v1928_v2, 0.0 }
0x13a8   :  { %1931 = vadd.xlane.f32.xlu1 %v1930_v57 }
0x13a9   :  { %v1929_v4 = vmul.f32 %v1927_v3, %v1927_v3 }
0x13ab   :  { %v1933_v5 = vsel %vm74_vm0, %v1929_v4, 0.0 }
0x13ac   :  { %1934 = vadd.xlane.f32.xlu0 %v1933_v5 }
0x1431   :  { %v1932_v8 = vpop.xlane.xlu1 %1931 }
0x1432   :  { %v1936_v9 = vmul.f32 0.03125, %v1932_v8 }
0x1434   :  { %v1938_v11 = vadd.f32 1e-12, %v1936_v9 }
0x1435   :  { %v1935_v12 = vpop.xlane.xlu0 %1934 }
0x1436   :  { %2640 = vrsqrt.f32 %v1938_v11  ;;  %v1937_v13 = vmul.f32 0.03125, %v1935_v12 }
0x1438   :  { %v1939_v14 = vadd.f32 1e-12, %v1937_v13 }
0x143a   :  { %2642 = vrsqrt.f32 %v1939_v14 }
0x1443   :  { %v2641_v16 = vpop.eup %2640 }
0x1444   :  { %v1942_v17 = vmul.f32 %v2641_v16, %v1926_v62 }
0x1446   :  { %v1950_v20 = vmul.f32 %v2220_v18, %v1942_v17 }
0x1447   :  { %v2643_v41 = vpop.eup %2642 }
0x1448   :  { %v1943_v19 = vmul.f32 %v2643_v41, %v1927_v3  ;;  %v1958_v24 = vadd.f32 %v2221_v22, %v1950_v20 }
0x144a   :  { %v1951_v21 = vmul.f32 %v2220_v18, %v1943_v19 }
0x144c   :  { %v1959_v23 = vadd.f32 %v2221_v22, %v1951_v21 }
0x144e   :  { %v1961_v25 = vrot.slane %v1959_v23, 7 }
0x1450   :  { %v1964_v26 = vsel %vm1963_vm6, %v1958_v24, %v1961_v25 }
0x1451   :  { %v1969_v27 = vpack.c.bf16 %v1964_v26, %v1964_v26 }
0x1453   :  { %2469 = vmatmul.mubr.msk.bf16.vlgmr.msra.gmra.mxu1 %vm74_vm0, %v1969_v27 }
0x1454   :  { %2476 = vmatprep.mubr.msk.bf16.mxu1 %vm2691_vm1, %v2690_v15  ;;  %2473 = vmatpush3.bf16.msra.mxu1 %v2550_v28 }
0x1455   :  { %2474 = vmatprep.subr.bf16.mxu1 %v2690_v15 }
0x1458   :  { %2475 = vmatpush3.bf16.msra.mxu1 %v2551_v29 }
0x1513   :  { %v2026_v33 = vpop.f32.mrf.mxu1 }
0x1514   :  { %v2027_v34 = vadd.f32 %v2222_v30, %v2026_v33 }
0x1515   :  { %v2470_v31 = vpop.f32.mrf.mxu1 }
0x1516   :  { %2644 = vtanh.f32 %v2027_v34 }
0x1517   :  { %v2029_v35 = vpop.f32.mrf.mxu1 }
0x1519   :  { %v2471_v36 = vpop.f32.mrf.mxu1 }
0x1523   :  { %v2645_v32 = vpop.eup %2644 }
0x1524   :  { %v2037_v37 = vpack.c.bf16 %v2645_v32, %v2645_v32  ;;  %2101 = vst.msk [vmem:[#allocation4] sm:$0x3] %vm2100_vm7, %v2645_v32 }
0x1526   :  { %2477 = vmatmul.mubr.msk.bf16.vlgmr.msra.gmra.mxu1 %vm74_vm0, %v2037_v37 }
0x1527   :  { %2657 = shalt.err (!%p2654_p4)
}
0x1528   :  { %2123 = dma.vmem_to_hbm [thread:$0]  %s2121_s4, 32, %s3271_s21, [#allocation5]   ;;  %v2226_v15 = vld [vmem:[%s3269_s19] ss:$0 sm:$0xff]  ;;  %vm2102_vm8 = vcmask 17408  }
0x1529   :  { %s2707_s25 = smov [#allocation2]  }
0x152a   :  { %s2110_s26 = sshll.u32 %s2707_s25, 4  ;;  %s2111_s26 = int_to_ptr.vmem [resolvable:$true] %s2110_s26 }
0x152b   :  { %s2666_s24 = scalar_lea.vmem %s2111_s26, 32  ;;  %p2671_p6 = scmp.lt.s32.totalorder %s2111_s26, %s2111_s26 }
0x152c   :  { %p2667_p5 = scmp.ne.s32.totalorder %s2111_s26, %s2666_s24  ;;  %p2672_p7 = scmp.lt.s32.totalorder %s2666_s24, %s2666_s24 }
0x152e   :  { %p2673_p8 = por %p2672_p7, %p2671_p6 }
0x1530   :  { %p2674_p9 = pnand %p2673_p8, %p2667_p5 }
0x15e6   :  { %v2094_v38 = vpop.f32.mrf.mxu1 }
0x15e7   :  { %v2095_v39 = vadd.f32 %v2226_v15, %v2094_v38 }
0x15e8   :  { %v2478_v40 = vpop.f32.mrf.mxu1 }
0x15e9   :  { %2103 = vst.msk [vmem:[#allocation2] sm:$0x3] %vm2102_vm8, %v2095_v39 }
0x15ea   :  { %v2097_v42 = vpop.f32.mrf.mxu1 }
0x15eb   :  { %2677 = shalt.err (!%p2674_p9)
}
0x15ec   :  { %2113 = dma.vmem_to_hbm [thread:$0]  %s2111_s26, 32, %s3270_s20, [#allocation3]   ;;  %v2479_v43 = vpop.f32.mrf.mxu1 }
0x15ed   :  { %2686 = dma.done.wait [#allocation3], 32  }
0x15ee   :  { %2687 = vsyncadd [#allocation3], 4294967264 }
0x15ef   :  { %2688 = dma.done.wait [#allocation5], 32  }
0x15f0   :  { %2689 = vsyncadd [#allocation5], 4294967264 }
0x15f1   :  { %2130 = vsyncpa [#allocation3], 1 }
0x15f2   :  { %2131 = vsyncpa [#allocation5], 1 }

</bundles_post_ra>
